<compile_context>
chip_gen: v6e
topology: v6e:2x2x1
jax: 0.10.0
libtpu: 0.0.40
codegen_flags: <defaults>
</compile_context>

<pallas_src>
from functools import partial

import jax
import jax.numpy as jnp
from jax.experimental import pallas as pl
from jax.experimental.pallas import tpu as pltpu


def _pick_tile(n, target=256):
    """Largest divisor of n that is <= target and a multiple of 8; else n (full extent).
    target >= 256 keeps the v6e/v7x 256x256 MXU full; 128 suffices on v5e."""
    if n <= target:
        return n
    for t in range(target, 7, -1):
        if n % t == 0 and t % 8 == 0:
            return t
    return n


def _vmem_limit_bytes():
    """Generation-aware scoped-VMEM limit: ~75% of physical, capped at 100 MiB.
    v5e/v6e (128 MiB physical) -> 96 MiB; v7x (64 MiB physical) -> 48 MiB."""
    try:
        cap = pltpu.get_tpu_info().vmem_capacity_bytes
    except Exception:
        cap = 64 * 1024 * 1024  # conservative fallback, safe on every generation
    return min(int(cap) * 3 // 4, 100 * 1024 * 1024)


def pack_params(params, *, n_head, n_head_feat):
    """One-time offline repacking (call ONCE, outside the per-step path):
       * fold 1/sqrt(D) into the Q columns of W_qkv,
       * cast matmul weights to bf16 (MXU operands; f32 accumulation in-kernel).
    No per-head padding: heads keep their natural D-column slots."""
    f32, bf16 = jnp.float32, jnp.bfloat16
    HD = n_head * n_head_feat
    scale = n_head_feat ** (-0.5)
    wqkv = params["wqkv"].astype(f32)
    wqkv = wqkv.at[:, :HD].multiply(scale)          # fold 1/sqrt(D) into the Q projection
    return dict(
        gamma=params["gamma"].astype(f32),
        beta=params["beta"].astype(f32),
        wqkv=wqkv.astype(bf16),
        wout=params["wout"].astype(bf16),
        bout=params["bout"].astype(f32),
        w1=params["w1"].astype(bf16),
        b1=params["b1"].astype(f32),
        w2=params["w2"].astype(bf16),
        b2=params["b2"].astype(f32),
    )


def transformer_block_kernel(
    x_ref, gamma_ref, beta_ref, wqkv_ref, wout_ref, bout_ref,
    w1_ref, b1_ref, w2_ref, b2_ref,
    o_ref,
    qkv_sc, ho_sc,
    *, n_head, head_dim, seq_len, q_tile, kv_tile, eps=1e-5,
):
    """Grid step = (batch element b, query tile qi).

    x_ref    : (1, N, F) f32   whole sequence of one batch element (resident per b)
    wqkv_ref : (F, 3*H*D) bf16 columns [Q | K | V], head-major; Q pre-scaled by 1/sqrt(D)
    wout_ref : (H*D, F)  bf16 ; w1_ref : (F, M) bf16 ; w2_ref : (M, F) bf16
    gamma/beta/bout/b1/b2 : (1, .) f32
    o_ref    : (1, tq, F)
    qkv_sc   : (N, 3*H*D) bf16  VMEM cache of full-sequence QKV (written at qi == 0)
    ho_sc    : (tq, H*D)  bf16  concatenated per-head attention outputs
    """
    f32, bf16 = jnp.float32, jnp.bfloat16
    H, D, N = n_head, head_dim, seq_len
    HD = H * D
    tq, tk = q_tile, kv_tile
    qi = pl.program_id(1)

    gamma = gamma_ref[...]                          # (1, F)
    beta = beta_ref[...]                            # (1, F)

    def layernorm(t):
        # single-pass statistics (sum / sum-of-squares): fewer serialized XLU reduces
        inv_n = 1.0 / t.shape[-1]
        mu = jnp.sum(t, axis=-1, keepdims=True) * inv_n
        ex2 = jnp.sum(t * t, axis=-1, keepdims=True) * inv_n
        var = ex2 - mu * mu
        return (t - mu) * jax.lax.rsqrt(var + eps) * gamma + beta

    # ---- once per batch element: full-sequence LN + QKV projection into VMEM ----
    @pl.when(qi == 0)
    def _():
        h = layernorm(x_ref[0].astype(f32))                         # (N, F)
        qkv = jnp.dot(h.astype(bf16), wqkv_ref[...],
                      preferred_element_type=f32)                   # (N, 3*H*D) f32 acc
        qkv_sc[...] = qkv.astype(bf16)

    # ---- per query tile: attention + residual + MLP + residual ----
    q0 = pl.multiple_of(qi * tq, tq)
    x_rows = x_ref[:, pl.ds(q0, tq), :][0].astype(f32)              # (tq, F)
    q_rows = qkv_sc[pl.ds(q0, tq), 0:HD]                            # (tq, H*D) bf16 (scaled)

    n_kv = N // tk
    # Static unroll over heads (H is small here). For large H convert to a
    # lax.fori_loop / head grid axis to bound live ranges.
    for hh in range(H):
        q_h = q_rows[:, hh * D:(hh + 1) * D]                        # (tq, D)

        def kv_step(j, carry, _q=q_h, _hh=hh):
            m_i, l_i, acc = carry
            k0 = pl.multiple_of(j * tk, tk)
            k_j = qkv_sc[pl.ds(k0, tk), HD + _hh * D:HD + (_hh + 1) * D]          # (tk, D)
            v_j = qkv_sc[pl.ds(k0, tk), 2 * HD + _hh * D:2 * HD + (_hh + 1) * D]  # (tk, D)
            s = jax.lax.dot_general(_q, k_j, (((1,), (1,)), ((), ())),
                                    preferred_element_type=f32)                    # (tq, tk)
            m_new = jnp.maximum(m_i, jnp.max(s, axis=-1, keepdims=True))
            alpha = jnp.exp(m_i - m_new)
            p = jnp.exp(s - m_new)
            l_new = alpha * l_i + jnp.sum(p, axis=-1, keepdims=True)
            acc_new = alpha * acc + jnp.dot(p.astype(bf16), v_j,
                                            preferred_element_type=f32)            # (tq, D)
            return m_new, l_new, acc_new

        init = (jnp.full((tq, 1), -jnp.inf, f32),
                jnp.zeros((tq, 1), f32),
                jnp.zeros((tq, D), f32))
        m_i, l_i, acc = jax.lax.fori_loop(0, n_kv, kv_step, init, unroll=(n_kv <= 8))

        inv_l = pl.reciprocal(l_i, approx=True)     # EUP slot; ~1e-3 relative error
        ho_sc[:, hh * D:(hh + 1) * D] = (acc * inv_l).astype(bf16)

    # One large-K output projection: the MXU accumulates across heads for free.
    attn = jnp.dot(ho_sc[...], wout_ref[...], preferred_element_type=f32) + bout_ref[...]
    x1 = attn + x_rows                              # residual 1 (f32)

    h2 = layernorm(x1)
    ff = jnp.dot(h2.astype(bf16), w1_ref[...], preferred_element_type=f32) + b1_ref[...]
    # exact (erf) GELU matches torch.nn.GELU(); tanh-approx (EUP) is an option when the
    # VALU is the binding slot and bit-matching is not required.
    ff = 0.5 * ff * (1.0 + jax.lax.erf(ff * (2.0 ** -0.5)))
    ff = jnp.dot(ff.astype(bf16), w2_ref[...], preferred_element_type=f32) + b2_ref[...]

    o_ref[0] = (ff + x1).astype(o_ref.dtype)        # residual 2


def _weight_spec(shape, single_buffer):
    nd = len(shape)
    idx = lambda b, qi, _nd=nd: (0,) * _nd          # same block for every grid step
    if single_buffer:
        # Resident across the whole grid -> one VMEM copy instead of the default two.
        return pl.BlockSpec(shape, idx, pipeline_mode=pl.Buffered(1))
    return pl.BlockSpec(shape, idx)


def _transformer_block_call(x, p, *, n_head, n_head_feat, n_mlp_feat, single_buffer_weights):
    B, N, F = x.shape
    H, D = n_head, n_head_feat
    HD = H * D
    M = n_mlp_feat
    tq = _pick_tile(N, 256)
    tk = _pick_tile(N, 512)
    num_q = N // tq

    kernel = partial(transformer_block_kernel, n_head=H, head_dim=D, seq_len=N,
                     q_tile=tq, kv_tile=tk)
    ws = lambda shape: _weight_spec(shape, single_buffer_weights)

    return pl.pallas_call(
        kernel,
        out_shape=jax.ShapeDtypeStruct((B, N, F), x.dtype),
        grid=(B, num_q),
        in_specs=[
            pl.BlockSpec((1, N, F), lambda b, qi: (b, 0, 0)),   # x: whole sequence per b
            ws((1, F)),            # gamma
            ws((1, F)),            # beta
            ws((F, 3 * HD)),       # W_qkv (bf16, Q pre-scaled, unpadded)
            ws((HD, F)),           # W_out (bf16)
            ws((1, F)),            # b_out
            ws((F, M)),            # W1
            ws((1, M)),            # b1
            ws((M, F)),            # W2
            ws((1, F)),            # b2
        ],
        # NOTE: for F < 128 a lane-dense (1, tq*F) output slab would avoid masked partial
        # stores; realistic F is a multiple of 128, so the natural layout is kept here.
        out_specs=pl.BlockSpec((1, tq, F), lambda b, qi: (b, qi, 0)),
        scratch_shapes=[
            pltpu.VMEM((N, 3 * HD), jnp.bfloat16),   # cached full-sequence QKV
            pltpu.VMEM((tq, HD), jnp.bfloat16),      # concatenated head outputs
        ],
        compiler_params=pltpu.CompilerParams(
            # batch shards across TensorCores (v7x megacore); query tiles stay sequential
            # on one core so the qi==0 QKV cache is visible to every tile of that batch.
            dimension_semantics=("parallel", "arbitrary"),
            vmem_limit_bytes=_vmem_limit_bytes()),
    )(x, p["gamma"], p["beta"], p["wqkv"], p["wout"], p["bout"],
      p["w1"], p["b1"], p["w2"], p["b2"])


def transformer_block(x, packed_params, *, n_head, n_head_feat, n_mlp_feat):
    try:
        return _transformer_block_call(
            x, packed_params, n_head=n_head, n_head_feat=n_head_feat,
            n_mlp_feat=n_mlp_feat, single_buffer_weights=True)
    except Exception:
        # pl.Buffered(1) not supported by this jax build -> default double buffering.
        return _transformer_block_call(
            x, packed_params, n_head=n_head, n_head_feat=n_head_feat,
            n_mlp_feat=n_mlp_feat, single_buffer_weights=False)


def ref_forward(x, params, *, n_head, n_head_feat):
    """Pure-JAX f32 reference of the original module's semantics."""
    def ln(t):
        mu = t.mean(-1, keepdims=True)
        var = ((t - mu) ** 2).mean(-1, keepdims=True)
        return (t - mu) / jnp.sqrt(var + 1e-5) * params["gamma"] + params["beta"]

    B, N, F = x.shape
    D = n_head_feat
    h = ln(x)
    qkv = h @ params["wqkv"]
    q, k, v = jnp.split(qkv, 3, axis=-1)
    heads = lambda t: t.reshape(B, N, n_head, D).transpose(0, 2, 1, 3)
    q, k, v = heads(q), heads(k), heads(v)
    dots = jnp.einsum("bhnd,bhmd->bhnm", q, k) * (D ** -0.5)
    attn = jax.nn.softmax(dots, axis=-1)
    o = jnp.einsum("bhnm,bhmd->bhnd", attn, v).transpose(0, 2, 1, 3).reshape(B, N, n_head * D)
    x1 = o @ params["wout"] + params["bout"] + x
    h2 = ln(x1)
    ff = jax.nn.gelu(h2 @ params["w1"] + params["b1"], approximate=False)
    ff = ff @ params["w2"] + params["b2"]
    return ff + x1


if __name__ == "__main__":
    # Small shapes consistent with the module's forward: x is (B, N, n_feat)
    B, N = 2, 8
    n_feat, n_head, n_head_feat, n_mlp_feat = 32, 4, 8, 64
    HD = n_head * n_head_feat

    key = jax.random.PRNGKey(0)
    ks = jax.random.split(key, 8)
    init = lambda k, shape, scale=0.02: (scale * jax.random.normal(k, shape)).astype(jnp.float32)

    params = {
        "gamma": jnp.ones((1, n_feat), jnp.float32),
        "beta": jnp.zeros((1, n_feat), jnp.float32),
        "wqkv": init(ks[0], (n_feat, 3 * HD)),
        "wout": init(ks[1], (HD, n_feat)),
        "bout": init(ks[2], (1, n_feat)),
        "w1": init(ks[3], (n_feat, n_mlp_feat)),
        "b1": init(ks[4], (1, n_mlp_feat)),
        "w2": init(ks[5], (n_mlp_feat, n_feat)),
        "b2": init(ks[6], (1, n_feat)),
    }
    x = jax.random.normal(ks[7], (B, N, n_feat), jnp.float32)

    # Offline, one-time weight repacking (scale fold + bf16 cast).
    packed = pack_params(params, n_head=n_head, n_head_feat=n_head_feat)

    out = transformer_block(x, packed, n_head=n_head, n_head_feat=n_head_feat,
                            n_mlp_feat=n_mlp_feat)
    out = jax.block_until_ready(out)

    ref = ref_forward(x, params, n_head=n_head, n_head_feat=n_head_feat)
    assert out.shape == (B, N, n_feat)
    # bf16 MXU operands + approx reciprocal -> tolerance loosened vs the pure-f32 reference
    assert jnp.allclose(out, ref, rtol=2e-2, atol=2e-2), "mismatch vs pure-JAX reference"

    print("KERNEL_OK")
</pallas_src>

<mosaic_0001>
module attributes {stable_mosaic.version = 11 : i64} {
  func.func @transformer_block_kernel(%arg0: i32, %arg1: i32, %arg2: memref<1x8x32xf32, #tpu.memory_space<vmem>>, %arg3: memref<1x32xf32, #tpu.memory_space<vmem>>, %arg4: memref<1x32xf32, #tpu.memory_space<vmem>>, %arg5: memref<32x96xbf16, #tpu.memory_space<vmem>>, %arg6: memref<32x32xbf16, #tpu.memory_space<vmem>>, %arg7: memref<1x32xf32, #tpu.memory_space<vmem>>, %arg8: memref<32x64xbf16, #tpu.memory_space<vmem>>, %arg9: memref<1x64xf32, #tpu.memory_space<vmem>>, %arg10: memref<64x32xbf16, #tpu.memory_space<vmem>>, %arg11: memref<1x32xf32, #tpu.memory_space<vmem>>, %arg12: memref<1x8x32xf32, #tpu.memory_space<vmem>>, %arg13: memref<8x96xbf16, #tpu.memory_space<vmem>>, %arg14: memref<8x32xbf16, #tpu.memory_space<vmem>>) attributes {dimension_semantics = [#tpu.dimension_semantics<parallel>, #tpu.dimension_semantics<arbitrary>], iteration_bounds = array<i64: 2, 1>, scalar_prefetch = 0 : i64, scratch_operands = 2 : i64, tpu.core_type = #tpu.core_type<tc>, window_params = [{transform_indices = @transform_0, window_bounds = array<i64: 1, 8, 32>}, {pipeline_mode = #tpu.pipeline_mode<synchronous>, transform_indices = @transform_1, window_bounds = array<i64: 1, 32>}, {pipeline_mode = #tpu.pipeline_mode<synchronous>, transform_indices = @transform_2, window_bounds = array<i64: 1, 32>}, {pipeline_mode = #tpu.pipeline_mode<synchronous>, transform_indices = @transform_3, window_bounds = array<i64: 32, 96>}, {pipeline_mode = #tpu.pipeline_mode<synchronous>, transform_indices = @transform_4, window_bounds = array<i64: 32, 32>}, {pipeline_mode = #tpu.pipeline_mode<synchronous>, transform_indices = @transform_5, window_bounds = array<i64: 1, 32>}, {pipeline_mode = #tpu.pipeline_mode<synchronous>, transform_indices = @transform_6, window_bounds = array<i64: 32, 64>}, {pipeline_mode = #tpu.pipeline_mode<synchronous>, transform_indices = @transform_7, window_bounds = array<i64: 1, 64>}, {pipeline_mode = #tpu.pipeline_mode<synchronous>, transform_indices = @transform_8, window_bounds = array<i64: 64, 32>}, {pipeline_mode = #tpu.pipeline_mode<synchronous>, transform_indices = @transform_9, window_bounds = array<i64: 1, 32>}, {transform_indices = @transform_10, window_bounds = array<i64: 1, 8, 32>}]} {
    %c0 = arith.constant 0 : index
    %c0_0 = arith.constant 0 : index
    %0 = vector.load %arg3[%c0, %c0_0] : memref<1x32xf32, #tpu.memory_space<vmem>>, vector<1x32xf32>
    %c0_1 = arith.constant 0 : index
    %c0_2 = arith.constant 0 : index
    %1 = vector.load %arg4[%c0_1, %c0_2] : memref<1x32xf32, #tpu.memory_space<vmem>>, vector<1x32xf32>
    %c0_i32 = arith.constant 0 : i32
    %2 = arith.cmpi eq, %arg1, %c0_i32 : i32
    %3 = arith.extui %2 : i1 to i32
    %c0_i32_3 = arith.constant 0 : i32
    %4 = arith.cmpi ne, %3, %c0_i32_3 : i32
    scf.if %4 {
      %c0_78 = arith.constant 0 : index
      %c0_79 = arith.constant 0 : index
      %c0_80 = arith.constant 0 : index
      %197 = vector.load %arg2[%c0_78, %c0_79, %c0_80] : memref<1x8x32xf32, #tpu.memory_space<vmem>>, vector<1x8x32xf32>
      %198 = vector.shape_cast %197 : vector<1x8x32xf32> to vector<8x32xf32>
      %cst_81 = arith.constant dense<0.000000e+00> : vector<8xf32>
      %199 = vector.multi_reduction <add>, %198, %cst_81 [1] : vector<8x32xf32> to vector<8xf32>
      %200 = vector.shape_cast %199 : vector<8xf32> to vector<8x1xf32>
      %cst_82 = arith.constant 3.125000e-02 : f32
      %201 = vector.broadcast %cst_82 : f32 to vector<8x1xf32>
      %202 = arith.mulf %200, %201 : vector<8x1xf32>
      %203 = arith.mulf %198, %198 : vector<8x32xf32>
      %cst_83 = arith.constant dense<0.000000e+00> : vector<8xf32>
      %204 = vector.multi_reduction <add>, %203, %cst_83 [1] : vector<8x32xf32> to vector<8xf32>
      %205 = vector.shape_cast %204 : vector<8xf32> to vector<8x1xf32>
      %cst_84 = arith.constant 3.125000e-02 : f32
      %206 = vector.broadcast %cst_84 : f32 to vector<8x1xf32>
      %207 = arith.mulf %205, %206 : vector<8x1xf32>
      %208 = arith.mulf %202, %202 : vector<8x1xf32>
      %209 = arith.subf %207, %208 : vector<8x1xf32>
      %210 = vector.broadcast %202 : vector<8x1xf32> to vector<8x32xf32>
      %211 = arith.subf %198, %210 : vector<8x32xf32>
      %cst_85 = arith.constant 9.99999974E-6 : f32
      %212 = vector.broadcast %cst_85 : f32 to vector<8x1xf32>
      %213 = arith.addf %209, %212 : vector<8x1xf32>
      %214 = math.rsqrt %213 : vector<8x1xf32>
      %215 = vector.broadcast %214 : vector<8x1xf32> to vector<8x32xf32>
      %216 = arith.mulf %211, %215 : vector<8x32xf32>
      %217 = vector.broadcast %0 : vector<1x32xf32> to vector<8x32xf32>
      %218 = arith.mulf %216, %217 : vector<8x32xf32>
      %219 = vector.broadcast %1 : vector<1x32xf32> to vector<8x32xf32>
      %220 = arith.addf %218, %219 : vector<8x32xf32>
      %221 = arith.truncf %220 : vector<8x32xf32> to vector<8x32xbf16>
      %c0_86 = arith.constant 0 : index
      %c0_87 = arith.constant 0 : index
      %222 = vector.load %arg5[%c0_86, %c0_87] : memref<32x96xbf16, #tpu.memory_space<vmem>>, vector<32x96xbf16>
      %cst_88 = arith.constant dense<0.000000e+00> : vector<8x96xf32>
      %223 = tpu.matmul %221, %222, %cst_88 {dimension_numbers = #tpu.dot_dimension_numbers<[1], [0], [0], [1], [0, 0, 1, 1], [], []>} : vector<8x32xbf16>, vector<32x96xbf16>, vector<8x96xf32> -> vector<8x96xf32>
      %224 = arith.truncf %223 : vector<8x96xf32> to vector<8x96xbf16>
      %c0_89 = arith.constant 0 : index
      %c0_90 = arith.constant 0 : index
      %225 = vector.load %arg13[%c0_89, %c0_90] : memref<8x96xbf16, #tpu.memory_space<vmem>>, vector<8x96xbf16>
      tpu.vector_store %arg13[%c0_89, %c0_90], %224 {strides = array<i32>} : memref<8x96xbf16, #tpu.memory_space<vmem>>, vector<8x96xbf16>,
    } else {
    }
    %c8_i32 = arith.constant 8 : i32
    %5 = arith.muli %arg1, %c8_i32 : i32
    %6 = tpu.assume_multiple %5, 8 : i32
    %c0_4 = arith.constant 0 : index
    %7 = arith.index_cast %6 : i32 to index
    %c0_5 = arith.constant 0 : index
    %8 = vector.load %arg2[%c0_4, %7, %c0_5] : memref<1x8x32xf32, #tpu.memory_space<vmem>>, vector<1x8x32xf32>
    %9 = vector.shape_cast %8 : vector<1x8x32xf32> to vector<8x32xf32>
    %10 = arith.index_cast %6 : i32 to index
    %c0_6 = arith.constant 0 : index
    %11 = vector.load %arg13[%10, %c0_6] : memref<8x96xbf16, #tpu.memory_space<vmem>>, vector<8x32xbf16>
    %12 = vector.extract_strided_slice %11 {offsets = [0, 0], sizes = [8, 8], strides = [1, 1]} : vector<8x32xbf16> to vector<8x8xbf16>
    %cst = arith.constant 0xFF800000 : f32
    %13 = vector.broadcast %cst : f32 to vector<8x1xf32>
    %cst_7 = arith.constant 0.000000e+00 : f32
    %14 = vector.broadcast %cst_7 : f32 to vector<8x1xf32>
    %cst_8 = arith.constant 0.000000e+00 : f32
    %15 = vector.broadcast %cst_8 : f32 to vector<8x8xf32>
    %c0_i32_9 = arith.constant 0 : i32
    %c8_i32_10 = arith.constant 8 : i32
    %16 = arith.muli %c0_i32_9, %c8_i32_10 : i32
    %17 = tpu.assume_multiple %16, 8 : i32
    %18 = arith.index_cast %17 : i32 to index
    %c32 = arith.constant 32 : index
    %19 = vector.load %arg13[%18, %c32] : memref<8x96xbf16, #tpu.memory_space<vmem>>, vector<8x8xbf16>
    %20 = arith.index_cast %17 : i32 to index
    %c64 = arith.constant 64 : index
    %21 = vector.load %arg13[%20, %c64] : memref<8x96xbf16, #tpu.memory_space<vmem>>, vector<8x8xbf16>
    %cst_11 = arith.constant dense<0.000000e+00> : vector<8x8xf32>
    %22 = tpu.matmul %12, %19, %cst_11 {dimension_numbers = #tpu.dot_dimension_numbers<[1], [1], [0], [0], [0, 0, 1, 0], [], []>} : vector<8x8xbf16>, vector<8x8xbf16>, vector<8x8xf32> -> vector<8x8xf32>
    %cst_12 = arith.constant dense<0xFF800000> : vector<8xf32>
    %23 = vector.multi_reduction <maximumf>, %22, %cst_12 [1] : vector<8x8xf32> to vector<8xf32>
    %24 = vector.shape_cast %23 : vector<8xf32> to vector<8x1xf32>
    %25 = arith.maximumf %13, %24 : vector<8x1xf32>
    %26 = arith.subf %13, %25 : vector<8x1xf32>
    %27 = math.exp %26 : vector<8x1xf32>
    %28 = vector.broadcast %25 : vector<8x1xf32> to vector<8x8xf32>
    %29 = arith.subf %22, %28 : vector<8x8xf32>
    %30 = math.exp %29 : vector<8x8xf32>
    %31 = arith.mulf %27, %14 : vector<8x1xf32>
    %cst_13 = arith.constant dense<0.000000e+00> : vector<8xf32>
    %32 = vector.multi_reduction <add>, %30, %cst_13 [1] : vector<8x8xf32> to vector<8xf32>
    %33 = vector.shape_cast %32 : vector<8xf32> to vector<8x1xf32>
    %34 = arith.addf %31, %33 : vector<8x1xf32>
    %35 = vector.broadcast %27 : vector<8x1xf32> to vector<8x8xf32>
    %36 = arith.mulf %35, %15 : vector<8x8xf32>
    %37 = arith.truncf %30 : vector<8x8xf32> to vector<8x8xbf16>
    %cst_14 = arith.constant dense<0.000000e+00> : vector<8x8xf32>
    %38 = tpu.matmul %37, %21, %cst_14 {dimension_numbers = #tpu.dot_dimension_numbers<[1], [0], [0], [1], [0, 0, 1, 1], [], []>} : vector<8x8xbf16>, vector<8x8xbf16>, vector<8x8xf32> -> vector<8x8xf32>
    %39 = arith.addf %36, %38 : vector<8x8xf32>
    %c1_i32 = arith.constant 1 : i32
    %40 = tpu.reciprocal %34 {approx = true} : vector<8x1xf32> -> vector<8x1xf32>
    %41 = vector.broadcast %40 : vector<8x1xf32> to vector<8x8xf32>
    %42 = arith.mulf %39, %41 : vector<8x8xf32>
    %43 = arith.truncf %42 : vector<8x8xf32> to vector<8x8xbf16>
    %c0_15 = arith.constant 0 : index
    %c0_16 = arith.constant 0 : index
    %44 = vector.load %arg14[%c0_15, %c0_16] : memref<8x32xbf16, #tpu.memory_space<vmem>>, vector<8x8xbf16>
    tpu.vector_store %arg14[%c0_15, %c0_16], %43 {strides = array<i32>} : memref<8x32xbf16, #tpu.memory_space<vmem>>, vector<8x8xbf16>,
    %45 = vector.extract_strided_slice %11 {offsets = [0, 8], sizes = [8, 8], strides = [1, 1]} : vector<8x32xbf16> to vector<8x8xbf16>
    %cst_17 = arith.constant 0xFF800000 : f32
    %46 = vector.broadcast %cst_17 : f32 to vector<8x1xf32>
    %cst_18 = arith.constant 0.000000e+00 : f32
    %47 = vector.broadcast %cst_18 : f32 to vector<8x1xf32>
    %cst_19 = arith.constant 0.000000e+00 : f32
    %48 = vector.broadcast %cst_19 : f32 to vector<8x8xf32>
    %c0_i32_20 = arith.constant 0 : i32
    %c8_i32_21 = arith.constant 8 : i32
    %49 = arith.muli %c0_i32_20, %c8_i32_21 : i32
    %50 = tpu.assume_multiple %49, 8 : i32
    %51 = arith.index_cast %50 : i32 to index
    %c40 = arith.constant 40 : index
    %52 = vector.load %arg13[%51, %c40] : memref<8x96xbf16, #tpu.memory_space<vmem>>, vector<8x8xbf16>
    %53 = arith.index_cast %50 : i32 to index
    %c72 = arith.constant 72 : index
    %54 = vector.load %arg13[%53, %c72] : memref<8x96xbf16, #tpu.memory_space<vmem>>, vector<8x8xbf16>
    %cst_22 = arith.constant dense<0.000000e+00> : vector<8x8xf32>
    %55 = tpu.matmul %45, %52, %cst_22 {dimension_numbers = #tpu.dot_dimension_numbers<[1], [1], [0], [0], [0, 0, 1, 0], [], []>} : vector<8x8xbf16>, vector<8x8xbf16>, vector<8x8xf32> -> vector<8x8xf32>
    %cst_23 = arith.constant dense<0xFF800000> : vector<8xf32>
    %56 = vector.multi_reduction <maximumf>, %55, %cst_23 [1] : vector<8x8xf32> to vector<8xf32>
    %57 = vector.shape_cast %56 : vector<8xf32> to vector<8x1xf32>
    %58 = arith.maximumf %46, %57 : vector<8x1xf32>
    %59 = arith.subf %46, %58 : vector<8x1xf32>
    %60 = math.exp %59 : vector<8x1xf32>
    %61 = vector.broadcast %58 : vector<8x1xf32> to vector<8x8xf32>
    %62 = arith.subf %55, %61 : vector<8x8xf32>
    %63 = math.exp %62 : vector<8x8xf32>
    %64 = arith.mulf %60, %47 : vector<8x1xf32>
    %cst_24 = arith.constant dense<0.000000e+00> : vector<8xf32>
    %65 = vector.multi_reduction <add>, %63, %cst_24 [1] : vector<8x8xf32> to vector<8xf32>
    %66 = vector.shape_cast %65 : vector<8xf32> to vector<8x1xf32>
    %67 = arith.addf %64, %66 : vector<8x1xf32>
    %68 = vector.broadcast %60 : vector<8x1xf32> to vector<8x8xf32>
    %69 = arith.mulf %68, %48 : vector<8x8xf32>
    %70 = arith.truncf %63 : vector<8x8xf32> to vector<8x8xbf16>
    %cst_25 = arith.constant dense<0.000000e+00> : vector<8x8xf32>
    %71 = tpu.matmul %70, %54, %cst_25 {dimension_numbers = #tpu.dot_dimension_numbers<[1], [0], [0], [1], [0, 0, 1, 1], [], []>} : vector<8x8xbf16>, vector<8x8xbf16>, vector<8x8xf32> -> vector<8x8xf32>
    %72 = arith.addf %69, %71 : vector<8x8xf32>
    %c1_i32_26 = arith.constant 1 : i32
    %73 = tpu.reciprocal %67 {approx = true} : vector<8x1xf32> -> vector<8x1xf32>
    %74 = vector.broadcast %73 : vector<8x1xf32> to vector<8x8xf32>
    %75 = arith.mulf %72, %74 : vector<8x8xf32>
    %76 = arith.truncf %75 : vector<8x8xf32> to vector<8x8xbf16>
    %c0_27 = arith.constant 0 : index
    %c8 = arith.constant 8 : index
    %77 = vector.load %arg14[%c0_27, %c8] : memref<8x32xbf16, #tpu.memory_space<vmem>>, vector<8x8xbf16>
    tpu.vector_store %arg14[%c0_27, %c8], %76 {strides = array<i32>} : memref<8x32xbf16, #tpu.memory_space<vmem>>, vector<8x8xbf16>,
    %78 = vector.extract_strided_slice %11 {offsets = [0, 16], sizes = [8, 8], strides = [1, 1]} : vector<8x32xbf16> to vector<8x8xbf16>
    %cst_28 = arith.constant 0xFF800000 : f32
    %79 = vector.broadcast %cst_28 : f32 to vector<8x1xf32>
    %cst_29 = arith.constant 0.000000e+00 : f32
    %80 = vector.broadcast %cst_29 : f32 to vector<8x1xf32>
    %cst_30 = arith.constant 0.000000e+00 : f32
    %81 = vector.broadcast %cst_30 : f32 to vector<8x8xf32>
    %c0_i32_31 = arith.constant 0 : i32
    %c8_i32_32 = arith.constant 8 : i32
    %82 = arith.muli %c0_i32_31, %c8_i32_32 : i32
    %83 = tpu.assume_multiple %82, 8 : i32
    %84 = arith.index_cast %83 : i32 to index
    %c48 = arith.constant 48 : index
    %85 = vector.load %arg13[%84, %c48] : memref<8x96xbf16, #tpu.memory_space<vmem>>, vector<8x8xbf16>
    %86 = arith.index_cast %83 : i32 to index
    %c80 = arith.constant 80 : index
    %87 = vector.load %arg13[%86, %c80] : memref<8x96xbf16, #tpu.memory_space<vmem>>, vector<8x8xbf16>
    %cst_33 = arith.constant dense<0.000000e+00> : vector<8x8xf32>
    %88 = tpu.matmul %78, %85, %cst_33 {dimension_numbers = #tpu.dot_dimension_numbers<[1], [1], [0], [0], [0, 0, 1, 0], [], []>} : vector<8x8xbf16>, vector<8x8xbf16>, vector<8x8xf32> -> vector<8x8xf32>
    %cst_34 = arith.constant dense<0xFF800000> : vector<8xf32>
    %89 = vector.multi_reduction <maximumf>, %88, %cst_34 [1] : vector<8x8xf32> to vector<8xf32>
    %90 = vector.shape_cast %89 : vector<8xf32> to vector<8x1xf32>
    %91 = arith.maximumf %79, %90 : vector<8x1xf32>
    %92 = arith.subf %79, %91 : vector<8x1xf32>
    %93 = math.exp %92 : vector<8x1xf32>
    %94 = vector.broadcast %91 : vector<8x1xf32> to vector<8x8xf32>
    %95 = arith.subf %88, %94 : vector<8x8xf32>
    %96 = math.exp %95 : vector<8x8xf32>
    %97 = arith.mulf %93, %80 : vector<8x1xf32>
    %cst_35 = arith.constant dense<0.000000e+00> : vector<8xf32>
    %98 = vector.multi_reduction <add>, %96, %cst_35 [1] : vector<8x8xf32> to vector<8xf32>
    %99 = vector.shape_cast %98 : vector<8xf32> to vector<8x1xf32>
    %100 = arith.addf %97, %99 : vector<8x1xf32>
    %101 = vector.broadcast %93 : vector<8x1xf32> to vector<8x8xf32>
    %102 = arith.mulf %101, %81 : vector<8x8xf32>
    %103 = arith.truncf %96 : vector<8x8xf32> to vector<8x8xbf16>
    %cst_36 = arith.constant dense<0.000000e+00> : vector<8x8xf32>
    %104 = tpu.matmul %103, %87, %cst_36 {dimension_numbers = #tpu.dot_dimension_numbers<[1], [0], [0], [1], [0, 0, 1, 1], [], []>} : vector<8x8xbf16>, vector<8x8xbf16>, vector<8x8xf32> -> vector<8x8xf32>
    %105 = arith.addf %102, %104 : vector<8x8xf32>
    %c1_i32_37 = arith.constant 1 : i32
    %106 = tpu.reciprocal %100 {approx = true} : vector<8x1xf32> -> vector<8x1xf32>
    %107 = vector.broadcast %106 : vector<8x1xf32> to vector<8x8xf32>
    %108 = arith.mulf %105, %107 : vector<8x8xf32>
    %109 = arith.truncf %108 : vector<8x8xf32> to vector<8x8xbf16>
    %c0_38 = arith.constant 0 : index
    %c16 = arith.constant 16 : index
    %110 = vector.load %arg14[%c0_38, %c16] : memref<8x32xbf16, #tpu.memory_space<vmem>>, vector<8x8xbf16>
    tpu.vector_store %arg14[%c0_38, %c16], %109 {strides = array<i32>} : memref<8x32xbf16, #tpu.memory_space<vmem>>, vector<8x8xbf16>,
    %111 = vector.extract_strided_slice %11 {offsets = [0, 24], sizes = [8, 8], strides = [1, 1]} : vector<8x32xbf16> to vector<8x8xbf16>
    %cst_39 = arith.constant 0xFF800000 : f32
    %112 = vector.broadcast %cst_39 : f32 to vector<8x1xf32>
    %cst_40 = arith.constant 0.000000e+00 : f32
    %113 = vector.broadcast %cst_40 : f32 to vector<8x1xf32>
    %cst_41 = arith.constant 0.000000e+00 : f32
    %114 = vector.broadcast %cst_41 : f32 to vector<8x8xf32>
    %c0_i32_42 = arith.constant 0 : i32
    %c8_i32_43 = arith.constant 8 : i32
    %115 = arith.muli %c0_i32_42, %c8_i32_43 : i32
    %116 = tpu.assume_multiple %115, 8 : i32
    %117 = arith.index_cast %116 : i32 to index
    %c56 = arith.constant 56 : index
    %118 = vector.load %arg13[%117, %c56] : memref<8x96xbf16, #tpu.memory_space<vmem>>, vector<8x8xbf16>
    %119 = arith.index_cast %116 : i32 to index
    %c88 = arith.constant 88 : index
    %120 = vector.load %arg13[%119, %c88] : memref<8x96xbf16, #tpu.memory_space<vmem>>, vector<8x8xbf16>
    %cst_44 = arith.constant dense<0.000000e+00> : vector<8x8xf32>
    %121 = tpu.matmul %111, %118, %cst_44 {dimension_numbers = #tpu.dot_dimension_numbers<[1], [1], [0], [0], [0, 0, 1, 0], [], []>} : vector<8x8xbf16>, vector<8x8xbf16>, vector<8x8xf32> -> vector<8x8xf32>
    %cst_45 = arith.constant dense<0xFF800000> : vector<8xf32>
    %122 = vector.multi_reduction <maximumf>, %121, %cst_45 [1] : vector<8x8xf32> to vector<8xf32>
    %123 = vector.shape_cast %122 : vector<8xf32> to vector<8x1xf32>
    %124 = arith.maximumf %112, %123 : vector<8x1xf32>
    %125 = arith.subf %112, %124 : vector<8x1xf32>
    %126 = math.exp %125 : vector<8x1xf32>
    %127 = vector.broadcast %124 : vector<8x1xf32> to vector<8x8xf32>
    %128 = arith.subf %121, %127 : vector<8x8xf32>
    %129 = math.exp %128 : vector<8x8xf32>
    %130 = arith.mulf %126, %113 : vector<8x1xf32>
    %cst_46 = arith.constant dense<0.000000e+00> : vector<8xf32>
    %131 = vector.multi_reduction <add>, %129, %cst_46 [1] : vector<8x8xf32> to vector<8xf32>
    %132 = vector.shape_cast %131 : vector<8xf32> to vector<8x1xf32>
    %133 = arith.addf %130, %132 : vector<8x1xf32>
    %134 = vector.broadcast %126 : vector<8x1xf32> to vector<8x8xf32>
    %135 = arith.mulf %134, %114 : vector<8x8xf32>
    %136 = arith.truncf %129 : vector<8x8xf32> to vector<8x8xbf16>
    %cst_47 = arith.constant dense<0.000000e+00> : vector<8x8xf32>
    %137 = tpu.matmul %136, %120, %cst_47 {dimension_numbers = #tpu.dot_dimension_numbers<[1], [0], [0], [1], [0, 0, 1, 1], [], []>} : vector<8x8xbf16>, vector<8x8xbf16>, vector<8x8xf32> -> vector<8x8xf32>
    %138 = arith.addf %135, %137 : vector<8x8xf32>
    %c1_i32_48 = arith.constant 1 : i32
    %139 = tpu.reciprocal %133 {approx = true} : vector<8x1xf32> -> vector<8x1xf32>
    %140 = vector.broadcast %139 : vector<8x1xf32> to vector<8x8xf32>
    %141 = arith.mulf %138, %140 : vector<8x8xf32>
    %142 = arith.truncf %141 : vector<8x8xf32> to vector<8x8xbf16>
    %c0_49 = arith.constant 0 : index
    %c24 = arith.constant 24 : index
    %143 = vector.load %arg14[%c0_49, %c24] : memref<8x32xbf16, #tpu.memory_space<vmem>>, vector<8x8xbf16>
    tpu.vector_store %arg14[%c0_49, %c24], %142 {strides = array<i32>} : memref<8x32xbf16, #tpu.memory_space<vmem>>, vector<8x8xbf16>,
    %c0_50 = arith.constant 0 : index
    %c0_51 = arith.constant 0 : index
    %144 = vector.load %arg14[%c0_50, %c0_51] : memref<8x32xbf16, #tpu.memory_space<vmem>>, vector<8x32xbf16>
    %c0_52 = arith.constant 0 : index
    %c0_53 = arith.constant 0 : index
    %145 = vector.load %arg6[%c0_52, %c0_53] : memref<32x32xbf16, #tpu.memory_space<vmem>>, vector<32x32xbf16>
    %cst_54 = arith.constant dense<0.000000e+00> : vector<8x32xf32>
    %146 = tpu.matmul %144, %145, %cst_54 {dimension_numbers = #tpu.dot_dimension_numbers<[1], [0], [0], [1], [0, 0, 1, 1], [], []>} : vector<8x32xbf16>, vector<32x32xbf16>, vector<8x32xf32> -> vector<8x32xf32>
    %c0_55 = arith.constant 0 : index
    %c0_56 = arith.constant 0 : index
    %147 = vector.load %arg7[%c0_55, %c0_56] : memref<1x32xf32, #tpu.memory_space<vmem>>, vector<1x32xf32>
    %148 = vector.broadcast %147 : vector<1x32xf32> to vector<8x32xf32>
    %149 = arith.addf %146, %148 : vector<8x32xf32>
    %150 = arith.addf %149, %9 : vector<8x32xf32>
    %cst_57 = arith.constant dense<0.000000e+00> : vector<8xf32>
    %151 = vector.multi_reduction <add>, %150, %cst_57 [1] : vector<8x32xf32> to vector<8xf32>
    %152 = vector.shape_cast %151 : vector<8xf32> to vector<8x1xf32>
    %cst_58 = arith.constant 3.125000e-02 : f32
    %153 = vector.broadcast %cst_58 : f32 to vector<8x1xf32>
    %154 = arith.mulf %152, %153 : vector<8x1xf32>
    %155 = arith.mulf %150, %150 : vector<8x32xf32>
    %cst_59 = arith.constant dense<0.000000e+00> : vector<8xf32>
    %156 = vector.multi_reduction <add>, %155, %cst_59 [1] : vector<8x32xf32> to vector<8xf32>
    %157 = vector.shape_cast %156 : vector<8xf32> to vector<8x1xf32>
    %cst_60 = arith.constant 3.125000e-02 : f32
    %158 = vector.broadcast %cst_60 : f32 to vector<8x1xf32>
    %159 = arith.mulf %157, %158 : vector<8x1xf32>
    %160 = arith.mulf %154, %154 : vector<8x1xf32>
    %161 = arith.subf %159, %160 : vector<8x1xf32>
    %162 = vector.broadcast %154 : vector<8x1xf32> to vector<8x32xf32>
    %163 = arith.subf %150, %162 : vector<8x32xf32>
    %cst_61 = arith.constant 9.99999974E-6 : f32
    %164 = vector.broadcast %cst_61 : f32 to vector<8x1xf32>
    %165 = arith.addf %161, %164 : vector<8x1xf32>
    %166 = math.rsqrt %165 : vector<8x1xf32>
    %167 = vector.broadcast %166 : vector<8x1xf32> to vector<8x32xf32>
    %168 = arith.mulf %163, %167 : vector<8x32xf32>
    %169 = vector.broadcast %0 : vector<1x32xf32> to vector<8x32xf32>
    %170 = arith.mulf %168, %169 : vector<8x32xf32>
    %171 = vector.broadcast %1 : vector<1x32xf32> to vector<8x32xf32>
    %172 = arith.addf %170, %171 : vector<8x32xf32>
    %173 = arith.truncf %172 : vector<8x32xf32> to vector<8x32xbf16>
    %c0_62 = arith.constant 0 : index
    %c0_63 = arith.constant 0 : index
    %174 = vector.load %arg8[%c0_62, %c0_63] : memref<32x64xbf16, #tpu.memory_space<vmem>>, vector<32x64xbf16>
    %cst_64 = arith.constant dense<0.000000e+00> : vector<8x64xf32>
    %175 = tpu.matmul %173, %174, %cst_64 {dimension_numbers = #tpu.dot_dimension_numbers<[1], [0], [0], [1], [0, 0, 1, 1], [], []>} : vector<8x32xbf16>, vector<32x64xbf16>, vector<8x64xf32> -> vector<8x64xf32>
    %c0_65 = arith.constant 0 : index
    %c0_66 = arith.constant 0 : index
    %176 = vector.load %arg9[%c0_65, %c0_66] : memref<1x64xf32, #tpu.memory_space<vmem>>, vector<1x64xf32>
    %177 = vector.broadcast %176 : vector<1x64xf32> to vector<8x64xf32>
    %178 = arith.addf %175, %177 : vector<8x64xf32>
    %cst_67 = arith.constant 5.000000e-01 : f32
    %179 = vector.broadcast %cst_67 : f32 to vector<8x64xf32>
    %180 = arith.mulf %179, %178 : vector<8x64xf32>
    %cst_68 = arith.constant 0.707106769 : f32
    %181 = vector.broadcast %cst_68 : f32 to vector<8x64xf32>
    %182 = arith.mulf %178, %181 : vector<8x64xf32>
    %183 = math.erf %182 : vector<8x64xf32>
    %cst_69 = arith.constant 1.000000e+00 : f32
    %184 = vector.broadcast %cst_69 : f32 to vector<8x64xf32>
    %185 = arith.addf %184, %183 : vector<8x64xf32>
    %186 = arith.mulf %180, %185 : vector<8x64xf32>
    %187 = arith.truncf %186 : vector<8x64xf32> to vector<8x64xbf16>
    %c0_70 = arith.constant 0 : index
    %c0_71 = arith.constant 0 : index
    %188 = vector.load %arg10[%c0_70, %c0_71] : memref<64x32xbf16, #tpu.memory_space<vmem>>, vector<64x32xbf16>
    %cst_72 = arith.constant dense<0.000000e+00> : vector<8x32xf32>
    %189 = tpu.matmul %187, %188, %cst_72 {dimension_numbers = #tpu.dot_dimension_numbers<[1], [0], [0], [1], [0, 0, 1, 1], [], []>} : vector<8x64xbf16>, vector<64x32xbf16>, vector<8x32xf32> -> vector<8x32xf32>
    %c0_73 = arith.constant 0 : index
    %c0_74 = arith.constant 0 : index
    %190 = vector.load %arg11[%c0_73, %c0_74] : memref<1x32xf32, #tpu.memory_space<vmem>>, vector<1x32xf32>
    %191 = vector.broadcast %190 : vector<1x32xf32> to vector<8x32xf32>
    %192 = arith.addf %189, %191 : vector<8x32xf32>
    %193 = arith.addf %192, %150 : vector<8x32xf32>
    %c0_75 = arith.constant 0 : index
    %c0_76 = arith.constant 0 : index
    %c0_77 = arith.constant 0 : index
    %194 = vector.load %arg12[%c0_75, %c0_76, %c0_77] : memref<1x8x32xf32, #tpu.memory_space<vmem>>, vector<1x8x32xf32>
    %195 = vector.shape_cast %194 : vector<1x8x32xf32> to vector<8x32xf32>
    %196 = vector.shape_cast %193 : vector<8x32xf32> to vector<1x8x32xf32>
    tpu.vector_store %arg12[%c0_75, %c0_76, %c0_77], %196 {strides = array<i32>} : memref<1x8x32xf32, #tpu.memory_space<vmem>>, vector<1x8x32xf32>,
    return
  }
  func.func @transform_0(%arg0: i32, %arg1: i32) -> (i32, i32, i32) {
    %c0_i32 = arith.constant 0 : i32
    %c0_i32_0 = arith.constant 0 : i32
    %c0_i32_1 = arith.constant 0 : i32
    return %arg0, %c0_i32, %c0_i32_0 : i32, i32, i32
  }
  func.func @transform_1(%arg0: i32, %arg1: i32) -> (i32, i32) {
    %c0_i32 = arith.constant 0 : i32
    %c0_i32_0 = arith.constant 0 : i32
    %c0_i32_1 = arith.constant 0 : i32
    return %c0_i32, %c0_i32_0 : i32, i32
  }
  func.func @transform_2(%arg0: i32, %arg1: i32) -> (i32, i32) {
    %c0_i32 = arith.constant 0 : i32
    %c0_i32_0 = arith.constant 0 : i32
    %c0_i32_1 = arith.constant 0 : i32
    return %c0_i32, %c0_i32_0 : i32, i32
  }
  func.func @transform_3(%arg0: i32, %arg1: i32) -> (i32, i32) {
    %c0_i32 = arith.constant 0 : i32
    %c0_i32_0 = arith.constant 0 : i32
    %c0_i32_1 = arith.constant 0 : i32
    return %c0_i32, %c0_i32_0 : i32, i32
  }
  func.func @transform_4(%arg0: i32, %arg1: i32) -> (i32, i32) {
    %c0_i32 = arith.constant 0 : i32
    %c0_i32_0 = arith.constant 0 : i32
    %c0_i32_1 = arith.constant 0 : i32
    return %c0_i32, %c0_i32_0 : i32, i32
  }
  func.func @transform_5(%arg0: i32, %arg1: i32) -> (i32, i32) {
    %c0_i32 = arith.constant 0 : i32
    %c0_i32_0 = arith.constant 0 : i32
    %c0_i32_1 = arith.constant 0 : i32
    return %c0_i32, %c0_i32_0 : i32, i32
  }
  func.func @transform_6(%arg0: i32, %arg1: i32) -> (i32, i32) {
    %c0_i32 = arith.constant 0 : i32
    %c0_i32_0 = arith.constant 0 : i32
    %c0_i32_1 = arith.constant 0 : i32
    return %c0_i32, %c0_i32_0 : i32, i32
  }
  func.func @transform_7(%arg0: i32, %arg1: i32) -> (i32, i32) {
    %c0_i32 = arith.constant 0 : i32
    %c0_i32_0 = arith.constant 0 : i32
    %c0_i32_1 = arith.constant 0 : i32
    return %c0_i32, %c0_i32_0 : i32, i32
  }
  func.func @transform_8(%arg0: i32, %arg1: i32) -> (i32, i32) {
    %c0_i32 = arith.constant 0 : i32
    %c0_i32_0 = arith.constant 0 : i32
    %c0_i32_1 = arith.constant 0 : i32
    return %c0_i32, %c0_i32_0 : i32, i32
  }
  func.func @transform_9(%arg0: i32, %arg1: i32) -> (i32, i32) {
    %c0_i32 = arith.constant 0 : i32
    %c0_i32_0 = arith.constant 0 : i32
    %c0_i32_1 = arith.constant 0 : i32
    return %c0_i32, %c0_i32_0 : i32, i32
  }
  func.func @transform_10(%arg0: i32, %arg1: i32) -> (i32, i32, i32) {
    %c0_i32 = arith.constant 0 : i32
    %c0_i32_0 = arith.constant 0 : i32
    return %arg0, %arg1, %c0_i32 : i32, i32, i32
  }
}

module attributes {stable_mosaic.version = 11 : i64} {
  func.func @transformer_block_kernel(%arg0: i32, %arg1: i32, %arg2: memref<1x8x32xf32, #tpu.memory_space<vmem>>, %arg3: memref<1x32xf32, #tpu.memory_space<vmem>>, %arg4: memref<1x32xf32, #tpu.memory_space<vmem>>, %arg5: memref<32x96xbf16, #tpu.memory_space<vmem>>, %arg6: memref<32x32xbf16, #tpu.memory_space<vmem>>, %arg7: memref<1x32xf32, #tpu.memory_space<vmem>>, %arg8: memref<32x64xbf16, #tpu.memory_space<vmem>>, %arg9: memref<1x64xf32, #tpu.memory_space<vmem>>, %arg10: memref<64x32xbf16, #tpu.memory_space<vmem>>, %arg11: memref<1x32xf32, #tpu.memory_space<vmem>>, %arg12: memref<1x8x32xf32, #tpu.memory_space<vmem>>, %arg13: memref<8x96xbf16, #tpu.memory_space<vmem>>, %arg14: memref<8x32xbf16, #tpu.memory_space<vmem>>) attributes {dimension_semantics = [#tpu.dimension_semantics<parallel>, #tpu.dimension_semantics<arbitrary>], iteration_bounds = array<i64: 2, 1>, scalar_prefetch = 0 : i64, scratch_operands = 2 : i64, tpu.core_type = #tpu.core_type<tc>, window_params = [{transform_indices = @transform_0, window_bounds = array<i64: 1, 8, 32>}, {pipeline_mode = #tpu.pipeline_mode<synchronous>, transform_indices = @transform_1, window_bounds = array<i64: 1, 32>}, {pipeline_mode = #tpu.pipeline_mode<synchronous>, transform_indices = @transform_2, window_bounds = array<i64: 1, 32>}, {pipeline_mode = #tpu.pipeline_mode<synchronous>, transform_indices = @transform_3, window_bounds = array<i64: 32, 96>}, {pipeline_mode = #tpu.pipeline_mode<synchronous>, transform_indices = @transform_4, window_bounds = array<i64: 32, 32>}, {pipeline_mode = #tpu.pipeline_mode<synchronous>, transform_indices = @transform_5, window_bounds = array<i64: 1, 32>}, {pipeline_mode = #tpu.pipeline_mode<synchronous>, transform_indices = @transform_6, window_bounds = array<i64: 32, 64>}, {pipeline_mode = #tpu.pipeline_mode<synchronous>, transform_indices = @transform_7, window_bounds = array<i64: 1, 64>}, {pipeline_mode = #tpu.pipeline_mode<synchronous>, transform_indices = @transform_8, window_bounds = array<i64: 64, 32>}, {pipeline_mode = #tpu.pipeline_mode<synchronous>, transform_indices = @transform_9, window_bounds = array<i64: 1, 32>}, {transform_indices = @transform_10, window_bounds = array<i64: 1, 8, 32>}]} {
    %c0 = arith.constant 0 : index
    %c0_0 = arith.constant 0 : index
    %0 = vector.load %arg3[%c0, %c0_0] : memref<1x32xf32, #tpu.memory_space<vmem>>, vector<1x32xf32>
    %c0_1 = arith.constant 0 : index
    %c0_2 = arith.constant 0 : index
    %1 = vector.load %arg4[%c0_1, %c0_2] : memref<1x32xf32, #tpu.memory_space<vmem>>, vector<1x32xf32>
    %c0_i32 = arith.constant 0 : i32
    %2 = arith.cmpi eq, %arg1, %c0_i32 : i32
    %3 = arith.extui %2 : i1 to i32
    %c0_i32_3 = arith.constant 0 : i32
    %4 = arith.cmpi ne, %3, %c0_i32_3 : i32
    scf.if %4 {
      %c0_78 = arith.constant 0 : index
      %c0_79 = arith.constant 0 : index
      %c0_80 = arith.constant 0 : index
      %197 = vector.load %arg2[%c0_78, %c0_79, %c0_80] : memref<1x8x32xf32, #tpu.memory_space<vmem>>, vector<1x8x32xf32>
      %198 = vector.shape_cast %197 : vector<1x8x32xf32> to vector<8x32xf32>
      %cst_81 = arith.constant dense<0.000000e+00> : vector<8xf32>
      %199 = vector.multi_reduction <add>, %198, %cst_81 [1] : vector<8x32xf32> to vector<8xf32>
      %200 = vector.shape_cast %199 : vector<8xf32> to vector<8x1xf32>
      %cst_82 = arith.constant 3.125000e-02 : f32
      %201 = vector.broadcast %cst_82 : f32 to vector<8x1xf32>
      %202 = arith.mulf %200, %201 : vector<8x1xf32>
      %203 = arith.mulf %198, %198 : vector<8x32xf32>
      %cst_83 = arith.constant dense<0.000000e+00> : vector<8xf32>
      %204 = vector.multi_reduction <add>, %203, %cst_83 [1] : vector<8x32xf32> to vector<8xf32>
      %205 = vector.shape_cast %204 : vector<8xf32> to vector<8x1xf32>
      %cst_84 = arith.constant 3.125000e-02 : f32
      %206 = vector.broadcast %cst_84 : f32 to vector<8x1xf32>
      %207 = arith.mulf %205, %206 : vector<8x1xf32>
      %208 = arith.mulf %202, %202 : vector<8x1xf32>
      %209 = arith.subf %207, %208 : vector<8x1xf32>
      %210 = vector.broadcast %202 : vector<8x1xf32> to vector<8x32xf32>
      %211 = arith.subf %198, %210 : vector<8x32xf32>
      %cst_85 = arith.constant 9.99999974E-6 : f32
      %212 = vector.broadcast %cst_85 : f32 to vector<8x1xf32>
      %213 = arith.addf %209, %212 : vector<8x1xf32>
      %214 = math.rsqrt %213 : vector<8x1xf32>
      %215 = vector.broadcast %214 : vector<8x1xf32> to vector<8x32xf32>
      %216 = arith.mulf %211, %215 : vector<8x32xf32>
      %217 = vector.broadcast %0 : vector<1x32xf32> to vector<8x32xf32>
      %218 = arith.mulf %216, %217 : vector<8x32xf32>
      %219 = vector.broadcast %1 : vector<1x32xf32> to vector<8x32xf32>
      %220 = arith.addf %218, %219 : vector<8x32xf32>
      %221 = arith.truncf %220 : vector<8x32xf32> to vector<8x32xbf16>
      %c0_86 = arith.constant 0 : index
      %c0_87 = arith.constant 0 : index
      %222 = vector.load %arg5[%c0_86, %c0_87] : memref<32x96xbf16, #tpu.memory_space<vmem>>, vector<32x96xbf16>
      %cst_88 = arith.constant dense<0.000000e+00> : vector<8x96xf32>
      %223 = tpu.matmul %221, %222, %cst_88 {dimension_numbers = #tpu.dot_dimension_numbers<[1], [0], [0], [1], [0, 0, 1, 1], [], []>} : vector<8x32xbf16>, vector<32x96xbf16>, vector<8x96xf32> -> vector<8x96xf32>
      %224 = arith.truncf %223 : vector<8x96xf32> to vector<8x96xbf16>
      %c0_89 = arith.constant 0 : index
      %c0_90 = arith.constant 0 : index
      %225 = vector.load %arg13[%c0_89, %c0_90] : memref<8x96xbf16, #tpu.memory_space<vmem>>, vector<8x96xbf16>
      tpu.vector_store %arg13[%c0_89, %c0_90], %224 {strides = array<i32>} : memref<8x96xbf16, #tpu.memory_space<vmem>>, vector<8x96xbf16>,
    } else {
    }
    %c8_i32 = arith.constant 8 : i32
    %5 = arith.muli %arg1, %c8_i32 : i32
    %6 = tpu.assume_multiple %5, 8 : i32
    %c0_4 = arith.constant 0 : index
    %7 = arith.index_cast %6 : i32 to index
    %c0_5 = arith.constant 0 : index
    %8 = vector.load %arg2[%c0_4, %7, %c0_5] : memref<1x8x32xf32, #tpu.memory_space<vmem>>, vector<1x8x32xf32>
    %9 = vector.shape_cast %8 : vector<1x8x32xf32> to vector<8x32xf32>
    %10 = arith.index_cast %6 : i32 to index
    %c0_6 = arith.constant 0 : index
    %11 = vector.load %arg13[%10, %c0_6] : memref<8x96xbf16, #tpu.memory_space<vmem>>, vector<8x32xbf16>
    %12 = vector.extract_strided_slice %11 {offsets = [0, 0], sizes = [8, 8], strides = [1, 1]} : vector<8x32xbf16> to vector<8x8xbf16>
    %cst = arith.constant 0xFF800000 : f32
    %13 = vector.broadcast %cst : f32 to vector<8x1xf32>
    %cst_7 = arith.constant 0.000000e+00 : f32
    %14 = vector.broadcast %cst_7 : f32 to vector<8x1xf32>
    %cst_8 = arith.constant 0.000000e+00 : f32
    %15 = vector.broadcast %cst_8 : f32 to vector<8x8xf32>
    %c0_i32_9 = arith.constant 0 : i32
    %c8_i32_10 = arith.constant 8 : i32
    %16 = arith.muli %c0_i32_9, %c8_i32_10 : i32
    %17 = tpu.assume_multiple %16, 8 : i32
    %18 = arith.index_cast %17 : i32 to index
    %c32 = arith.constant 32 : index
    %19 = vector.load %arg13[%18, %c32] : memref<8x96xbf16, #tpu.memory_space<vmem>>, vector<8x8xbf16>
    %20 = arith.index_cast %17 : i32 to index
    %c64 = arith.constant 64 : index
    %21 = vector.load %arg13[%20, %c64] : memref<8x96xbf16, #tpu.memory_space<vmem>>, vector<8x8xbf16>
    %cst_11 = arith.constant dense<0.000000e+00> : vector<8x8xf32>
    %22 = tpu.matmul %12, %19, %cst_11 {dimension_numbers = #tpu.dot_dimension_numbers<[1], [1], [0], [0], [0, 0, 1, 0], [], []>} : vector<8x8xbf16>, vector<8x8xbf16>, vector<8x8xf32> -> vector<8x8xf32>
    %cst_12 = arith.constant dense<0xFF800000> : vector<8xf32>
    %23 = vector.multi_reduction <maximumf>, %22, %cst_12 [1] : vector<8x8xf32> to vector<8xf32>
    %24 = vector.shape_cast %23 : vector<8xf32> to vector<8x1xf32>
    %25 = arith.maximumf %13, %24 : vector<8x1xf32>
    %26 = arith.subf %13, %25 : vector<8x1xf32>
    %27 = math.exp %26 : vector<8x1xf32>
    %28 = vector.broadcast %25 : vector<8x1xf32> to vector<8x8xf32>
    %29 = arith.subf %22, %28 : vector<8x8xf32>
    %30 = math.exp %29 : vector<8x8xf32>
    %31 = arith.mulf %27, %14 : vector<8x1xf32>
    %cst_13 = arith.constant dense<0.000000e+00> : vector<8xf32>
    %32 = vector.multi_reduction <add>, %30, %cst_13 [1] : vector<8x8xf32> to vector<8xf32>
    %33 = vector.shape_cast %32 : vector<8xf32> to vector<8x1xf32>
    %34 = arith.addf %31, %33 : vector<8x1xf32>
    %35 = vector.broadcast %27 : vector<8x1xf32> to vector<8x8xf32>
    %36 = arith.mulf %35, %15 : vector<8x8xf32>
    %37 = arith.truncf %30 : vector<8x8xf32> to vector<8x8xbf16>
    %cst_14 = arith.constant dense<0.000000e+00> : vector<8x8xf32>
    %38 = tpu.matmul %37, %21, %cst_14 {dimension_numbers = #tpu.dot_dimension_numbers<[1], [0], [0], [1], [0, 0, 1, 1], [], []>} : vector<8x8xbf16>, vector<8x8xbf16>, vector<8x8xf32> -> vector<8x8xf32>
    %39 = arith.addf %36, %38 : vector<8x8xf32>
    %c1_i32 = arith.constant 1 : i32
    %40 = tpu.reciprocal %34 {approx = true} : vector<8x1xf32> -> vector<8x1xf32>
    %41 = vector.broadcast %40 : vector<8x1xf32> to vector<8x8xf32>
    %42 = arith.mulf %39, %41 : vector<8x8xf32>
    %43 = arith.truncf %42 : vector<8x8xf32> to vector<8x8xbf16>
    %c0_15 = arith.constant 0 : index
    %c0_16 = arith.constant 0 : index
    %44 = vector.load %arg14[%c0_15, %c0_16] : memref<8x32xbf16, #tpu.memory_space<vmem>>, vector<8x8xbf16>
    tpu.vector_store %arg14[%c0_15, %c0_16], %43 {strides = array<i32>} : memref<8x32xbf16, #tpu.memory_space<vmem>>, vector<8x8xbf16>,
    %45 = vector.extract_strided_slice %11 {offsets = [0, 8], sizes = [8, 8], strides = [1, 1]} : vector<8x32xbf16> to vector<8x8xbf16>
    %cst_17 = arith.constant 0xFF800000 : f32
    %46 = vector.broadcast %cst_17 : f32 to vector<8x1xf32>
    %cst_18 = arith.constant 0.000000e+00 : f32
    %47 = vector.broadcast %cst_18 : f32 to vector<8x1xf32>
    %cst_19 = arith.constant 0.000000e+00 : f32
    %48 = vector.broadcast %cst_19 : f32 to vector<8x8xf32>
    %c0_i32_20 = arith.constant 0 : i32
    %c8_i32_21 = arith.constant 8 : i32
    %49 = arith.muli %c0_i32_20, %c8_i32_21 : i32
    %50 = tpu.assume_multiple %49, 8 : i32
    %51 = arith.index_cast %50 : i32 to index
    %c40 = arith.constant 40 : index
    %52 = vector.load %arg13[%51, %c40] : memref<8x96xbf16, #tpu.memory_space<vmem>>, vector<8x8xbf16>
    %53 = arith.index_cast %50 : i32 to index
    %c72 = arith.constant 72 : index
    %54 = vector.load %arg13[%53, %c72] : memref<8x96xbf16, #tpu.memory_space<vmem>>, vector<8x8xbf16>
    %cst_22 = arith.constant dense<0.000000e+00> : vector<8x8xf32>
    %55 = tpu.matmul %45, %52, %cst_22 {dimension_numbers = #tpu.dot_dimension_numbers<[1], [1], [0], [0], [0, 0, 1, 0], [], []>} : vector<8x8xbf16>, vector<8x8xbf16>, vector<8x8xf32> -> vector<8x8xf32>
    %cst_23 = arith.constant dense<0xFF800000> : vector<8xf32>
    %56 = vector.multi_reduction <maximumf>, %55, %cst_23 [1] : vector<8x8xf32> to vector<8xf32>
    %57 = vector.shape_cast %56 : vector<8xf32> to vector<8x1xf32>
    %58 = arith.maximumf %46, %57 : vector<8x1xf32>
    %59 = arith.subf %46, %58 : vector<8x1xf32>
    %60 = math.exp %59 : vector<8x1xf32>
    %61 = vector.broadcast %58 : vector<8x1xf32> to vector<8x8xf32>
    %62 = arith.subf %55, %61 : vector<8x8xf32>
    %63 = math.exp %62 : vector<8x8xf32>
    %64 = arith.mulf %60, %47 : vector<8x1xf32>
    %cst_24 = arith.constant dense<0.000000e+00> : vector<8xf32>
    %65 = vector.multi_reduction <add>, %63, %cst_24 [1] : vector<8x8xf32> to vector<8xf32>
    %66 = vector.shape_cast %65 : vector<8xf32> to vector<8x1xf32>
    %67 = arith.addf %64, %66 : vector<8x1xf32>
    %68 = vector.broadcast %60 : vector<8x1xf32> to vector<8x8xf32>
    %69 = arith.mulf %68, %48 : vector<8x8xf32>
    %70 = arith.truncf %63 : vector<8x8xf32> to vector<8x8xbf16>
    %cst_25 = arith.constant dense<0.000000e+00> : vector<8x8xf32>
    %71 = tpu.matmul %70, %54, %cst_25 {dimension_numbers = #tpu.dot_dimension_numbers<[1], [0], [0], [1], [0, 0, 1, 1], [], []>} : vector<8x8xbf16>, vector<8x8xbf16>, vector<8x8xf32> -> vector<8x8xf32>
    %72 = arith.addf %69, %71 : vector<8x8xf32>
    %c1_i32_26 = arith.constant 1 : i32
    %73 = tpu.reciprocal %67 {approx = true} : vector<8x1xf32> -> vector<8x1xf32>
    %74 = vector.broadcast %73 : vector<8x1xf32> to vector<8x8xf32>
    %75 = arith.mulf %72, %74 : vector<8x8xf32>
    %76 = arith.truncf %75 : vector<8x8xf32> to vector<8x8xbf16>
    %c0_27 = arith.constant 0 : index
    %c8 = arith.constant 8 : index
    %77 = vector.load %arg14[%c0_27, %c8] : memref<8x32xbf16, #tpu.memory_space<vmem>>, vector<8x8xbf16>
    tpu.vector_store %arg14[%c0_27, %c8], %76 {strides = array<i32>} : memref<8x32xbf16, #tpu.memory_space<vmem>>, vector<8x8xbf16>,
    %78 = vector.extract_strided_slice %11 {offsets = [0, 16], sizes = [8, 8], strides = [1, 1]} : vector<8x32xbf16> to vector<8x8xbf16>
    %cst_28 = arith.constant 0xFF800000 : f32
    %79 = vector.broadcast %cst_28 : f32 to vector<8x1xf32>
    %cst_29 = arith.constant 0.000000e+00 : f32
    %80 = vector.broadcast %cst_29 : f32 to vector<8x1xf32>
    %cst_30 = arith.constant 0.000000e+00 : f32
    %81 = vector.broadcast %cst_30 : f32 to vector<8x8xf32>
    %c0_i32_31 = arith.constant 0 : i32
    %c8_i32_32 = arith.constant 8 : i32
    %82 = arith.muli %c0_i32_31, %c8_i32_32 : i32
    %83 = tpu.assume_multiple %82, 8 : i32
    %84 = arith.index_cast %83 : i32 to index
    %c48 = arith.constant 48 : index
    %85 = vector.load %arg13[%84, %c48] : memref<8x96xbf16, #tpu.memory_space<vmem>>, vector<8x8xbf16>
    %86 = arith.index_cast %83 : i32 to index
    %c80 = arith.constant 80 : index
    %87 = vector.load %arg13[%86, %c80] : memref<8x96xbf16, #tpu.memory_space<vmem>>, vector<8x8xbf16>
    %cst_33 = arith.constant dense<0.000000e+00> : vector<8x8xf32>
    %88 = tpu.matmul %78, %85, %cst_33 {dimension_numbers = #tpu.dot_dimension_numbers<[1], [1], [0], [0], [0, 0, 1, 0], [], []>} : vector<8x8xbf16>, vector<8x8xbf16>, vector<8x8xf32> -> vector<8x8xf32>
    %cst_34 = arith.constant dense<0xFF800000> : vector<8xf32>
    %89 = vector.multi_reduction <maximumf>, %88, %cst_34 [1] : vector<8x8xf32> to vector<8xf32>
    %90 = vector.shape_cast %89 : vector<8xf32> to vector<8x1xf32>
    %91 = arith.maximumf %79, %90 : vector<8x1xf32>
    %92 = arith.subf %79, %91 : vector<8x1xf32>
    %93 = math.exp %92 : vector<8x1xf32>
    %94 = vector.broadcast %91 : vector<8x1xf32> to vector<8x8xf32>
    %95 = arith.subf %88, %94 : vector<8x8xf32>
    %96 = math.exp %95 : vector<8x8xf32>
    %97 = arith.mulf %93, %80 : vector<8x1xf32>
    %cst_35 = arith.constant dense<0.000000e+00> : vector<8xf32>
    %98 = vector.multi_reduction <add>, %96, %cst_35 [1] : vector<8x8xf32> to vector<8xf32>
    %99 = vector.shape_cast %98 : vector<8xf32> to vector<8x1xf32>
    %100 = arith.addf %97, %99 : vector<8x1xf32>
    %101 = vector.broadcast %93 : vector<8x1xf32> to vector<8x8xf32>
    %102 = arith.mulf %101, %81 : vector<8x8xf32>
    %103 = arith.truncf %96 : vector<8x8xf32> to vector<8x8xbf16>
    %cst_36 = arith.constant dense<0.000000e+00> : vector<8x8xf32>
    %104 = tpu.matmul %103, %87, %cst_36 {dimension_numbers = #tpu.dot_dimension_numbers<[1], [0], [0], [1], [0, 0, 1, 1], [], []>} : vector<8x8xbf16>, vector<8x8xbf16>, vector<8x8xf32> -> vector<8x8xf32>
    %105 = arith.addf %102, %104 : vector<8x8xf32>
    %c1_i32_37 = arith.constant 1 : i32
    %106 = tpu.reciprocal %100 {approx = true} : vector<8x1xf32> -> vector<8x1xf32>
    %107 = vector.broadcast %106 : vector<8x1xf32> to vector<8x8xf32>
    %108 = arith.mulf %105, %107 : vector<8x8xf32>
    %109 = arith.truncf %108 : vector<8x8xf32> to vector<8x8xbf16>
    %c0_38 = arith.constant 0 : index
    %c16 = arith.constant 16 : index
    %110 = vector.load %arg14[%c0_38, %c16] : memref<8x32xbf16, #tpu.memory_space<vmem>>, vector<8x8xbf16>
    tpu.vector_store %arg14[%c0_38, %c16], %109 {strides = array<i32>} : memref<8x32xbf16, #tpu.memory_space<vmem>>, vector<8x8xbf16>,
    %111 = vector.extract_strided_slice %11 {offsets = [0, 24], sizes = [8, 8], strides = [1, 1]} : vector<8x32xbf16> to vector<8x8xbf16>
    %cst_39 = arith.constant 0xFF800000 : f32
    %112 = vector.broadcast %cst_39 : f32 to vector<8x1xf32>
    %cst_40 = arith.constant 0.000000e+00 : f32
    %113 = vector.broadcast %cst_40 : f32 to vector<8x1xf32>
    %cst_41 = arith.constant 0.000000e+00 : f32
    %114 = vector.broadcast %cst_41 : f32 to vector<8x8xf32>
    %c0_i32_42 = arith.constant 0 : i32
    %c8_i32_43 = arith.constant 8 : i32
    %115 = arith.muli %c0_i32_42, %c8_i32_43 : i32
    %116 = tpu.assume_multiple %115, 8 : i32
    %117 = arith.index_cast %116 : i32 to index
    %c56 = arith.constant 56 : index
    %118 = vector.load %arg13[%117, %c56] : memref<8x96xbf16, #tpu.memory_space<vmem>>, vector<8x8xbf16>
    %119 = arith.index_cast %116 : i32 to index
    %c88 = arith.constant 88 : index
    %120 = vector.load %arg13[%119, %c88] : memref<8x96xbf16, #tpu.memory_space<vmem>>, vector<8x8xbf16>
    %cst_44 = arith.constant dense<0.000000e+00> : vector<8x8xf32>
    %121 = tpu.matmul %111, %118, %cst_44 {dimension_numbers = #tpu.dot_dimension_numbers<[1], [1], [0], [0], [0, 0, 1, 0], [], []>} : vector<8x8xbf16>, vector<8x8xbf16>, vector<8x8xf32> -> vector<8x8xf32>
    %cst_45 = arith.constant dense<0xFF800000> : vector<8xf32>
    %122 = vector.multi_reduction <maximumf>, %121, %cst_45 [1] : vector<8x8xf32> to vector<8xf32>
    %123 = vector.shape_cast %122 : vector<8xf32> to vector<8x1xf32>
    %124 = arith.maximumf %112, %123 : vector<8x1xf32>
    %125 = arith.subf %112, %124 : vector<8x1xf32>
    %126 = math.exp %125 : vector<8x1xf32>
    %127 = vector.broadcast %124 : vector<8x1xf32> to vector<8x8xf32>
    %128 = arith.subf %121, %127 : vector<8x8xf32>
    %129 = math.exp %128 : vector<8x8xf32>
    %130 = arith.mulf %126, %113 : vector<8x1xf32>
    %cst_46 = arith.constant dense<0.000000e+00> : vector<8xf32>
    %131 = vector.multi_reduction <add>, %129, %cst_46 [1] : vector<8x8xf32> to vector<8xf32>
    %132 = vector.shape_cast %131 : vector<8xf32> to vector<8x1xf32>
    %133 = arith.addf %130, %132 : vector<8x1xf32>
    %134 = vector.broadcast %126 : vector<8x1xf32> to vector<8x8xf32>
    %135 = arith.mulf %134, %114 : vector<8x8xf32>
    %136 = arith.truncf %129 : vector<8x8xf32> to vector<8x8xbf16>
    %cst_47 = arith.constant dense<0.000000e+00> : vector<8x8xf32>
    %137 = tpu.matmul %136, %120, %cst_47 {dimension_numbers = #tpu.dot_dimension_numbers<[1], [0], [0], [1], [0, 0, 1, 1], [], []>} : vector<8x8xbf16>, vector<8x8xbf16>, vector<8x8xf32> -> vector<8x8xf32>
    %138 = arith.addf %135, %137 : vector<8x8xf32>
    %c1_i32_48 = arith.constant 1 : i32
    %139 = tpu.reciprocal %133 {approx = true} : vector<8x1xf32> -> vector<8x1xf32>
    %140 = vector.broadcast %139 : vector<8x1xf32> to vector<8x8xf32>
    %141 = arith.mulf %138, %140 : vector<8x8xf32>
    %142 = arith.truncf %141 : vector<8x8xf32> to vector<8x8xbf16>
    %c0_49 = arith.constant 0 : index
    %c24 = arith.constant 24 : index
    %143 = vector.load %arg14[%c0_49, %c24] : memref<8x32xbf16, #tpu.memory_space<vmem>>, vector<8x8xbf16>
    tpu.vector_store %arg14[%c0_49, %c24], %142 {strides = array<i32>} : memref<8x32xbf16, #tpu.memory_space<vmem>>, vector<8x8xbf16>,
    %c0_50 = arith.constant 0 : index
    %c0_51 = arith.constant 0 : index
    %144 = vector.load %arg14[%c0_50, %c0_51] : memref<8x32xbf16, #tpu.memory_space<vmem>>, vector<8x32xbf16>
    %c0_52 = arith.constant 0 : index
    %c0_53 = arith.constant 0 : index
    %145 = vector.load %arg6[%c0_52, %c0_53] : memref<32x32xbf16, #tpu.memory_space<vmem>>, vector<32x32xbf16>
    %cst_54 = arith.constant dense<0.000000e+00> : vector<8x32xf32>
    %146 = tpu.matmul %144, %145, %cst_54 {dimension_numbers = #tpu.dot_dimension_numbers<[1], [0], [0], [1], [0, 0, 1, 1], [], []>} : vector<8x32xbf16>, vector<32x32xbf16>, vector<8x32xf32> -> vector<8x32xf32>
    %c0_55 = arith.constant 0 : index
    %c0_56 = arith.constant 0 : index
    %147 = vector.load %arg7[%c0_55, %c0_56] : memref<1x32xf32, #tpu.memory_space<vmem>>, vector<1x32xf32>
    %148 = vector.broadcast %147 : vector<1x32xf32> to vector<8x32xf32>
    %149 = arith.addf %146, %148 : vector<8x32xf32>
    %150 = arith.addf %149, %9 : vector<8x32xf32>
    %cst_57 = arith.constant dense<0.000000e+00> : vector<8xf32>
    %151 = vector.multi_reduction <add>, %150, %cst_57 [1] : vector<8x32xf32> to vector<8xf32>
    %152 = vector.shape_cast %151 : vector<8xf32> to vector<8x1xf32>
    %cst_58 = arith.constant 3.125000e-02 : f32
    %153 = vector.broadcast %cst_58 : f32 to vector<8x1xf32>
    %154 = arith.mulf %152, %153 : vector<8x1xf32>
    %155 = arith.mulf %150, %150 : vector<8x32xf32>
    %cst_59 = arith.constant dense<0.000000e+00> : vector<8xf32>
    %156 = vector.multi_reduction <add>, %155, %cst_59 [1] : vector<8x32xf32> to vector<8xf32>
    %157 = vector.shape_cast %156 : vector<8xf32> to vector<8x1xf32>
    %cst_60 = arith.constant 3.125000e-02 : f32
    %158 = vector.broadcast %cst_60 : f32 to vector<8x1xf32>
    %159 = arith.mulf %157, %158 : vector<8x1xf32>
    %160 = arith.mulf %154, %154 : vector<8x1xf32>
    %161 = arith.subf %159, %160 : vector<8x1xf32>
    %162 = vector.broadcast %154 : vector<8x1xf32> to vector<8x32xf32>
    %163 = arith.subf %150, %162 : vector<8x32xf32>
    %cst_61 = arith.constant 9.99999974E-6 : f32
    %164 = vector.broadcast %cst_61 : f32 to vector<8x1xf32>
    %165 = arith.addf %161, %164 : vector<8x1xf32>
    %166 = math.rsqrt %165 : vector<8x1xf32>
    %167 = vector.broadcast %166 : vector<8x1xf32> to vector<8x32xf32>
    %168 = arith.mulf %163, %167 : vector<8x32xf32>
    %169 = vector.broadcast %0 : vector<1x32xf32> to vector<8x32xf32>
    %170 = arith.mulf %168, %169 : vector<8x32xf32>
    %171 = vector.broadcast %1 : vector<1x32xf32> to vector<8x32xf32>
    %172 = arith.addf %170, %171 : vector<8x32xf32>
    %173 = arith.truncf %172 : vector<8x32xf32> to vector<8x32xbf16>
    %c0_62 = arith.constant 0 : index
    %c0_63 = arith.constant 0 : index
    %174 = vector.load %arg8[%c0_62, %c0_63] : memref<32x64xbf16, #tpu.memory_space<vmem>>, vector<32x64xbf16>
    %cst_64 = arith.constant dense<0.000000e+00> : vector<8x64xf32>
    %175 = tpu.matmul %173, %174, %cst_64 {dimension_numbers = #tpu.dot_dimension_numbers<[1], [0], [0], [1], [0, 0, 1, 1], [], []>} : vector<8x32xbf16>, vector<32x64xbf16>, vector<8x64xf32> -> vector<8x64xf32>
    %c0_65 = arith.constant 0 : index
    %c0_66 = arith.constant 0 : index
    %176 = vector.load %arg9[%c0_65, %c0_66] : memref<1x64xf32, #tpu.memory_space<vmem>>, vector<1x64xf32>
    %177 = vector.broadcast %176 : vector<1x64xf32> to vector<8x64xf32>
    %178 = arith.addf %175, %177 : vector<8x64xf32>
    %cst_67 = arith.constant 5.000000e-01 : f32
    %179 = vector.broadcast %cst_67 : f32 to vector<8x64xf32>
    %180 = arith.mulf %179, %178 : vector<8x64xf32>
    %cst_68 = arith.constant 0.707106769 : f32
    %181 = vector.broadcast %cst_68 : f32 to vector<8x64xf32>
    %182 = arith.mulf %178, %181 : vector<8x64xf32>
    %183 = math.erf %182 : vector<8x64xf32>
    %cst_69 = arith.constant 1.000000e+00 : f32
    %184 = vector.broadcast %cst_69 : f32 to vector<8x64xf32>
    %185 = arith.addf %184, %183 : vector<8x64xf32>
    %186 = arith.mulf %180, %185 : vector<8x64xf32>
    %187 = arith.truncf %186 : vector<8x64xf32> to vector<8x64xbf16>
    %c0_70 = arith.constant 0 : index
    %c0_71 = arith.constant 0 : index
    %188 = vector.load %arg10[%c0_70, %c0_71] : memref<64x32xbf16, #tpu.memory_space<vmem>>, vector<64x32xbf16>
    %cst_72 = arith.constant dense<0.000000e+00> : vector<8x32xf32>
    %189 = tpu.matmul %187, %188, %cst_72 {dimension_numbers = #tpu.dot_dimension_numbers<[1], [0], [0], [1], [0, 0, 1, 1], [], []>} : vector<8x64xbf16>, vector<64x32xbf16>, vector<8x32xf32> -> vector<8x32xf32>
    %c0_73 = arith.constant 0 : index
    %c0_74 = arith.constant 0 : index
    %190 = vector.load %arg11[%c0_73, %c0_74] : memref<1x32xf32, #tpu.memory_space<vmem>>, vector<1x32xf32>
    %191 = vector.broadcast %190 : vector<1x32xf32> to vector<8x32xf32>
    %192 = arith.addf %189, %191 : vector<8x32xf32>
    %193 = arith.addf %192, %150 : vector<8x32xf32>
    %c0_75 = arith.constant 0 : index
    %c0_76 = arith.constant 0 : index
    %c0_77 = arith.constant 0 : index
    %194 = vector.load %arg12[%c0_75, %c0_76, %c0_77] : memref<1x8x32xf32, #tpu.memory_space<vmem>>, vector<1x8x32xf32>
    %195 = vector.shape_cast %194 : vector<1x8x32xf32> to vector<8x32xf32>
    %196 = vector.shape_cast %193 : vector<8x32xf32> to vector<1x8x32xf32>
    tpu.vector_store %arg12[%c0_75, %c0_76, %c0_77], %196 {strides = array<i32>} : memref<1x8x32xf32, #tpu.memory_space<vmem>>, vector<1x8x32xf32>,
    return
  }
  func.func @transform_0(%arg0: i32, %arg1: i32) -> (i32, i32, i32) {
    %c0_i32 = arith.constant 0 : i32
    %c0_i32_0 = arith.constant 0 : i32
    %c0_i32_1 = arith.constant 0 : i32
    return %arg0, %c0_i32, %c0_i32_0 : i32, i32, i32
  }
  func.func @transform_1(%arg0: i32, %arg1: i32) -> (i32, i32) {
    %c0_i32 = arith.constant 0 : i32
    %c0_i32_0 = arith.constant 0 : i32
    %c0_i32_1 = arith.constant 0 : i32
    return %c0_i32, %c0_i32_0 : i32, i32
  }
  func.func @transform_2(%arg0: i32, %arg1: i32) -> (i32, i32) {
    %c0_i32 = arith.constant 0 : i32
    %c0_i32_0 = arith.constant 0 : i32
    %c0_i32_1 = arith.constant 0 : i32
    return %c0_i32, %c0_i32_0 : i32, i32
  }
  func.func @transform_3(%arg0: i32, %arg1: i32) -> (i32, i32) {
    %c0_i32 = arith.constant 0 : i32
    %c0_i32_0 = arith.constant 0 : i32
    %c0_i32_1 = arith.constant 0 : i32
    return %c0_i32, %c0_i32_0 : i32, i32
  }
  func.func @transform_4(%arg0: i32, %arg1: i32) -> (i32, i32) {
    %c0_i32 = arith.constant 0 : i32
    %c0_i32_0 = arith.constant 0 : i32
    %c0_i32_1 = arith.constant 0 : i32
    return %c0_i32, %c0_i32_0 : i32, i32
  }
  func.func @transform_5(%arg0: i32, %arg1: i32) -> (i32, i32) {
    %c0_i32 = arith.constant 0 : i32
    %c0_i32_0 = arith.constant 0 : i32
    %c0_i32_1 = arith.constant 0 : i32
    return %c0_i32, %c0_i32_0 : i32, i32
  }
  func.func @transform_6(%arg0: i32, %arg1: i32) -> (i32, i32) {
    %c0_i32 = arith.constant 0 : i32
    %c0_i32_0 = arith.constant 0 : i32
    %c0_i32_1 = arith.constant 0 : i32
    return %c0_i32, %c0_i32_0 : i32, i32
  }
  func.func @transform_7(%arg0: i32, %arg1: i32) -> (i32, i32) {
    %c0_i32 = arith.constant 0 : i32
    %c0_i32_0 = arith.constant 0 : i32
    %c0_i32_1 = arith.constant 0 : i32
    return %c0_i32, %c0_i32_0 : i32, i32
  }
  func.func @transform_8(%arg0: i32, %arg1: i32) -> (i32, i32) {
    %c0_i32 = arith.constant 0 : i32
    %c0_i32_0 = arith.constant 0 : i32
    %c0_i32_1 = arith.constant 0 : i32
    return %c0_i32, %c0_i32_0 : i32, i32
  }
  func.func @transform_9(%arg0: i32, %arg1: i32) -> (i32, i32) {
    %c0_i32 = arith.constant 0 : i32
    %c0_i32_0 = arith.constant 0 : i32
    %c0_i32_1 = arith.constant 0 : i32
    return %c0_i32, %c0_i32_0 : i32, i32
  }
  func.func @transform_10(%arg0: i32, %arg1: i32) -> (i32, i32, i32) {
    %c0_i32 = arith.constant 0 : i32
    %c0_i32_0 = arith.constant 0 : i32
    return %arg0, %arg1, %c0_i32 : i32, i32, i32
  }
}

</mosaic_0001>

<bundles_post_ra>
// kernel: tpu_custom_call.1
= control target key start
LH: loop header
LB: loop body
LE: loop exit
PB: predicated region body
PF: predicated region fallthrough
CT: control target
= control target key end

     0   :  { %15 = vsyncpa [#allocation5], 0  ;;  %s2117_s0 = inlined_call_operand.vmem [shape: f32[2,8,32], index: 0, kind: input, shape index: {}]   ;;  %s2118_s1 = inlined_call_operand.vmem [shape: f32[1,32], index: 1, kind: input, shape index: {}]   ;;  %s2119_s2 = inlined_call_operand.vmem [shape: f32[1,32], index: 2, kind: input, shape index: {}]   ;;  %s2120_s3 = inlined_call_operand.vmem [shape: bf16[32,96], index: 3, kind: input, shape index: {}]   ;;  %s2121_s4 = inlined_call_operand.vmem [shape: bf16[32,32], index: 4, kind: input, shape index: {}]   ;;  %s2122_s5 = inlined_call_operand.vmem [shape: f32[1,32], index: 5, kind: input, shape index: {}]   ;;  %s2123_s6 = inlined_call_operand.hbm [shape: bf16[32,64], index: 6, kind: input, shape index: {}]   ;;  %s2124_s7 = inlined_call_operand.vmem [shape: f32[1,64], index: 7, kind: input, shape index: {}]   ;;  %s2125_s8 = inlined_call_operand.vmem [shape: bf16[64,32], index: 8, kind: input, shape index: {}]   ;;  %s2126_s9 = inlined_call_operand.vmem [shape: f32[1,32], index: 9, kind: input, shape index: {}]   ;;  %s2127_s10 = inlined_call_operand.hbm [shape: f32[2,8,32], index: 10, kind: output, shape index: {}]  }
   0x1   :  { %16 = vsyncpa [#allocation6], 0 }
   0x2   :  { %18 = vsyncpa [#allocation6 + $0x1], 0  ;;  %s1838_s13 = smov 0   ;;  %s1840_s14 = smov 0  }
   0x3   :  { %s1842_s15 = smov 0   ;;  %s1844_s16 = smov 0  }
   0x4   :  { %s1846_s17 = smov 0   ;;  %s1848_s18 = smov 0  }
   0x5 LB: > { %2130 = sst [smem:[#allocation10_spill]] %s1757_s17  ;;  %s1361_s19 = sadd.s32 4294967295, %s1761_s18   ;;  %s1761_s18 = sphi %s1848_s18, %s24_s18   ;;  %s1757_s17 = sphi %s1846_s17, %s2137_s17   ;;  %s1753_s16 = sphi %s1844_s16, %s2136_s16   ;;  %s1749_s15 = sphi %s1842_s15, %s2140_s15   ;;  %s1745_s14 = sphi %s1840_s14, %s2139_s14   ;;  %s1741_s13 = sphi %s1838_s13, %s2138_s13  }
   0x6   : > { %s1362_s20 = sadd.s32 4294967294, %s1761_s18   ;;  %s36_s21 = sadd.s32 1, %s1757_s17 }
   0x7   : > { %s260_s22 = sadd.s32 1, %s1749_s15  ;;  %p38_p0 = scmp.ge.s32.totalorder %s36_s21, 2 }
   0x8   : > { %p270_p1 = scmp.ne.s32.totalorder %s1749_s15, %s1745_s14  ;;  %p271_p2 = scmp.eq.s32.totalorder %s1361_s19, 1 }
   0x9   : > { %p276_p3 = scmp.ne.s32.totalorder %s1745_s14, %s1741_s13  ;;  %s2142_s21 = smov (%p38_p0, %s36_s21), 0 }
   0xa   : > { %2131 = sst [smem:[#allocation11_spill]] %s2142_s21  ;;  %p1878_p4 = por %p271_p2, %p270_p1 }
   0xb   : > { %p277_p5 = scmp.eq.s32.totalorder %s1362_s20, 1  ;;  %s255_s24 = ssub.s32 %s1757_s17, %s2142_s21 }
   0xc   : > { %p1363_p6 = scmp.ge.s32.totalorder %s1761_s18, 1  ;;  %p258_p7 = scmp.eq.s32.totalorder %s255_s24, 0 }
   0xd   : > { %p1885_p8 = por %p277_p5, %p276_p3  ;;  %p284_p9 = scmp.lt.s32.totalorder %s1761_s18, 3 }
   0xe   : > { %s1891_s26 = scalar_select %p258_p7, %s1749_s15, %s260_s22  }
   0xf   : > { %p1893_p10 = pnand %p1363_p6, %p284_p9  ;;  %p1897_p11 = scmp.eq.s32.totalorder %s1361_s19, 0 }
  0x10   : > { %s1763_s29 = smov [#allocation4]  }
  0x11   : > { %p1532_p12 = pneg %p1893_p10  ;;  %s311_s30 = sshll.u32 %s1763_s29, 4  ;;  %s312_s30 = int_to_ptr.vmem [resolvable:$true] %s311_s30 }
  0x12   : > { %s1666_s11 = scalar_lea.vmem %s312_s30, 256  ;;  %p1674_p5 = scmp.lt.s32.totalorder %s312_s30, %s312_s30 }
  0x13   : > { %p1533_p13 = pnand %p1897_p11, %p1532_p12  ;;  %p1667_p1 = scmp.ne.s32.totalorder %s312_s30, %s1666_s11 }
  0x14   : > { %p1675_p6 = scmp.lt.s32.totalorder %s1666_s11, %s1666_s11 }
  0x15   : > { %p1657_p0 = pneg %p1533_p13 }
  0x16   : > { %p1676_p7 = por %p1675_p6, %p1674_p5 }
  0x17   : > { %p1669_p2 = pnand %p1667_p1, %p1657_p0 }
  0x19   : > { %p1670_p3 = pneg %p1669_p2 }
  0x1b   : > { %p1677_p9 = pnand %p1676_p7, %p1670_p3 }
  0x1d   : > { %1680 = shalt.err (!%p1677_p9)
}
  0x1e   : > { %s1764_s12 = smov 64   ;;  %s1765_s19 = smov 4  }
  0x1f   : > { %1535 = dma.hbm_to_vmem [thread:$0]  (!%p1533_p13), %s2123_s6, 256, %s312_s30, [#allocation5], %s1764_s12, %s1764_s12, %s1765_s19  }
  0x20   : > { %343 = sbr.rel (%p1893_p10) target bundleno = 2071 (0x817), region = 60 }
  0x25   : > { %1732 = dma.done.wait (%p1897_p11), [#allocation5], 256  }
  0x26   : > { %1734 = vsyncadd (%p1897_p11), [#allocation5], 4294967040  ;;  %p380_p12 = scmp.lt.s32.totalorder %s1753_s16, 1  ;;  %vm392_vm0 = vcmask 261120   ;;  %v1610_v4 = vld [vmem:[%s2120_s3 + $0x8] sm:$0xff]   ;;  %v1766_v5 = vmov 0.0  }
  0x27   : > { %1442 = vmatprep.subr.bf16.mxu0 %v1766_v5  ;;  %vm1767_vm1 = vmmov 0   ;;  %v1611_v6 = vld [vmem:[%s2120_s3] sm:$0xff]   ;;  %1450 = vmatprep.subr.bf16.mxu1 %v1766_v5  ;;  %vm483_vm2 = vcmask 781312   ;;  %s1768_s22 = smov 96   ;;  %s1771_s11 = smov 80   ;;  %vm499_vm3 = vcmask 64512  }
  0x28   : > { %s381_s24 = scalar_select %p380_p12, %s1753_s16, 1  ;;  %1446 = vmatprep.mubr.msk.bf16.mxu0 %vm1767_vm1, %v1766_v5  ;;  %1443 = vmatpush3.bf16.msra.mxu0 %v1610_v4  ;;  %v1944_v16 = vld [vmem:[%s2118_s1] ss:$0 sm:$0xff]  ;;  %vm566_vm4 = vcmask 1043456   ;;  %vm614_vm5 = vcmask 60416   ;;  %vm746_vm6 = vcmask 126016  }
  0x29   : > { %1444 = vmatprep.subr.bf16.mxu0 %v1766_v5  ;;  %1452 = vmatprep.mubr.msk.bf16.mxu1 %vm1767_vm1, %v1766_v5  ;;  %v1949_v18 = vld [vmem:[%s2119_s2] ss:$0 sm:$0xff]  ;;  %s1772_s27 = smov 112   ;;  %s1773_s28 = smov 72   ;;  %vm875_vm7 = vcmask 191616   ;;  %vm1004_vm8 = vcmask 257216  }
  0x2a   : > { %s1369_s29 = sshll.u32 %s381_s24, 3  ;;  %s1769_s24 = smov 120   ;;  %vm1216_vm9 = vcmask 523264  }
  0x2b   : > { %s383_s17 = scalar_lea.vmem %s2117_s0, %s1369_s29  ;;  %s1770_s29 = smov 88  }
  0x2c   : > { %v1919_v0 = vld [vmem:[%s383_s17] sm:$0xff]  ;;  %1445 = vmatpush3.bf16.msra.mxu0 %v1611_v6  ;;  %s1774_s17 = smov 104   ;;  %s1775_s21 = smov 64  }
  0x2d   : > { %v393_v1 = vsel %vm392_vm0, %v1919_v0, 0.0  ;;  %v397_v2 = vmul.f32 %v1919_v0, %v1919_v0  ;;  %1456 = vmatprep.subr.bf16.mxu0 %v1766_v5  ;;  %s1776_s30 = smov 56   ;;  %s1777_s12 = smov 48  }
  0x2e   : > { %394 = vadd.xlane.f32.xlu0 %v393_v1  ;;  %s1778_s19 = smov 40   ;;  %s1779_s20 = smov 8  }
  0x2f   : > { %v398_v3 = vsel %vm392_vm0, %v397_v2, 0.0 }
  0x32   : > { %399 = vadd.xlane.f32.xlu0 %v398_v3 }
  0xb7   : > { %v395_v7 = vpop.xlane.xlu0 %394 }
  0xb8   : > { %v396_v8 = vmul.f32 0.03125, %v395_v7 }
  0xba   : > { %v402_v10 = vmul.f32 %v396_v8, %v396_v8  ;;  %v404_v14 = vsub.f32 %v1919_v0, %v396_v8 }
  0xbb   : > { %v400_v9 = vpop.xlane.xlu0 %399 }
  0xbc   : > { %v401_v11 = vmul.f32 0.03125, %v400_v9 }
  0xbe   : > { %v403_v12 = vsub.f32 %v401_v11, %v402_v10 }
  0xc0   : > { %v405_v13 = vadd.f32 1e-05, %v403_v12 }
  0xc2   : > { %1625 = vrsqrt.f32 %v405_v13 }
  0xcf   : > { %v1626_v15 = vpop.eup %1625 }
  0xd0   : > { %v407_v17 = vmul.f32 %v1626_v15, %v404_v14 }
  0xd2   : > { %v414_v19 = vmul.f32 %v1944_v16, %v407_v17 }
  0xd4   : > { %v421_v20 = vadd.f32 %v1949_v18, %v414_v19 }
  0xd6   : > { %v422_v21 = vpack.c.bf16 %v421_v20, %v421_v20 }
  0xd8   : > { %1447 = vmatmul.mubr.msk.bf16.vlgmr.msra.gmra.mxu0 %vm392_vm0, %v422_v21 }
  0xd9   : > { %1458 = vmatprep.mubr.msk.bf16.mxu0 %vm1767_vm1, %v1766_v5 }
 0x198   : > { %v476_v22 = vpop.f32.mrf.mxu0 }
 0x199   : > { %v482_v23 = vpack.c.bf16 %v476_v22, %v476_v22 }
 0x19a   : > { %v1448_v24 = vpop.f32.mrf.mxu0 }
 0x19b   : > { %484 = vst.msk [vmem:[#allocation2] sm:$0xf] %vm483_vm2, %v482_v23 }
 0x19c   : > { %v479_v25 = vpop.f32.mrf.mxu0 }
 0x19e   : > { %v1449_v26 = vpop.f32.mrf.mxu0 }
 0x1a2   : > { %v1612_v27 = vld [vmem:[#allocation2] ss:$0 sps:$4 sm:$0xff]  }
 0x1a3   : > { %v492_v28 = vld [vmem:[#allocation2] sm:$0xf]  ;;  %497 = vrot.lane.b32.xlu1 %v1612_v27, %s1768_s22 }
 0x1a4   : > { %v1376_v29 = vcombine.low %v492_v28, %v492_v28  ;;  %v1956_v30 = vld [vmem:[#allocation2] ss:$0 sps:$4 sm:$0xff]  }
 0x1a5   : > { %v1959_v31 = vld [vmem:[#allocation2] ss:$0 sps:$4 sm:$0xff]  }
 0x1a6   : > { %620 = vrot.lane.b32.xlu0 %v1376_v29, %s1769_s24  ;;  %v1962_v32 = vld [vmem:[#allocation2] ss:$0 sps:$4 sm:$0xff]  }
 0x1a7   : > { %625 = vrot.lane.b32.xlu1 %v1956_v30, %s1770_s29 }
 0x1ab   : > { %754 = vrot.lane.b32.xlu1 %v1959_v31, %s1771_s11 }
 0x1af   : > { %749 = vrot.lane.b32.xlu1 %v1376_v29, %s1772_s27  ;;  %s1780_s27 = smov 16  }
 0x1b3   : > { %883 = vrot.lane.b32.xlu1 %v1962_v32, %s1773_s28  ;;  %s1781_s28 = smov 24  }
 0x1b7   : > { %878 = vrot.lane.b32.xlu1 %v1376_v29, %s1774_s17  ;;  %s377_s17 = sand.u32 1, %s1745_s14  }
 0x215   : > { %v498_v33 = vpop.permute.xlu1 %497 }
 0x216   : > { %v504_v34 = vsel %vm499_vm3, %v498_v33, 0 }
 0x217   : > { %1451 = vmatpush3.bf16.xpose.msra.mxu1 %v504_v34 }
 0x218   : > { %1462 = vmatprep.subr.bf16.mxu1 %v1766_v5  ;;  %v621_v38 = vpop.permute.xlu0 %620 }
 0x219   : > { %v626_v35 = vpop.permute.xlu1 %625 }
 0x21a   : > { %v631_v36 = vsel %vm499_vm3, %v626_v35, 0 }
 0x21d   : > { %v755_v37 = vpop.permute.xlu1 %754 }
 0x21e   : > { %1453 = vmatmul.mubr.msk.bf16.vlgmr.msra.gmra.mxu1 %vm499_vm3, %v492_v28  ;;  %v760_v40 = vsel %vm499_vm3, %v755_v37, 0 }
 0x21f   : > { %1463 = vmatpush3.bf16.xpose.msra.mxu1 %v631_v36  ;;  %1464 = vmatprep.mubr.msk.bf16.mxu1 %vm1767_vm1, %v1766_v5 }
 0x220   : > { %1474 = vmatprep.subr.bf16.mxu1 %v1766_v5 }
 0x221   : > { %v750_v39 = vpop.permute.xlu1 %749 }
 0x225   : > { %v884_v41 = vpop.permute.xlu1 %883 }
 0x226   : > { %1465 = vmatmul.mubr.msk.bf16.vlgmr.msra.gmra.mxu1 %vm499_vm3, %v621_v38  ;;  %v889_v42 = vsel %vm499_vm3, %v884_v41, 0 }
 0x227   : > { %1475 = vmatpush3.bf16.xpose.msra.mxu1 %v760_v40  ;;  %1476 = vmatprep.mubr.msk.bf16.mxu1 %vm1767_vm1, %v1766_v5 }
 0x228   : > { %1486 = vmatprep.subr.bf16.mxu1 %v1766_v5 }
 0x229   : > { %v879_v43 = vpop.permute.xlu1 %878 }
 0x22e   : > { %1477 = vmatmul.mubr.msk.bf16.vlgmr.msra.gmra.mxu1 %vm499_vm3, %v750_v39 }
 0x22f   : > { %1487 = vmatpush3.bf16.xpose.msra.mxu1 %v889_v42  ;;  %1488 = vmatprep.mubr.msk.bf16.mxu1 %vm1767_vm1, %v1766_v5 }
 0x230   : > { %1498 = vmatprep.subr.bf16.mxu1 %v1766_v5 }
 0x236   : > { %1489 = vmatmul.mubr.msk.bf16.vlgmr.msra.gmra.mxu1 %vm499_vm3, %v879_v43 }
 0x237   : > { %1502 = vmatprep.mubr.msk.bf16.mxu1 %vm1767_vm1, %v1766_v5 }
 0x2de   : > { %v540_v44 = vpop.f32.mrf.mxu1 }
 0x2df   : > { %v546_v45 = vsel %vm499_vm3, %v540_v44, -inf }
 0x2e0   : > { %547 = vmax.xlane.f32.xlu1 %v546_v45  ;;  %v1454_v46 = vpop.f32.mrf.mxu1 }
 0x2e2   : > { %v543_v47 = vpop.f32.mrf.mxu1 }
 0x2e4   : > { %v1455_v48 = vpop.f32.mrf.mxu1 }
 0x2e6   : > { %v667_v49 = vpop.f32.mrf.mxu1 }
 0x2e7   : > { %v673_v50 = vsel %vm499_vm3, %v667_v49, -inf }
 0x2e8   : > { %674 = vmax.xlane.f32.xlu0 %v673_v50  ;;  %v1466_v51 = vpop.f32.mrf.mxu1 }
 0x2ea   : > { %v670_v52 = vpop.f32.mrf.mxu1 }
 0x2ec   : > { %v1467_v53 = vpop.f32.mrf.mxu1 }
 0x2ee   : > { %v796_v54 = vpop.f32.mrf.mxu1 }
 0x2ef   : > { %v802_v63 = vsel %vm499_vm3, %v796_v54, -inf }
 0x2f0   : > { %v1478_v55 = vpop.f32.mrf.mxu1 }
 0x2f1   : > { %561 = vrot.lane.b32.xlu1 %v1612_v27, %s1775_s21  ;;  %s1368_s21 = sshll.u32 %s377_s17, 3 }
 0x2f2   : > { %v799_v56 = vpop.f32.mrf.mxu1 }
 0x2f4   : > { %v1479_v57 = vpop.f32.mrf.mxu1 }
 0x2f6   : > { %v925_v58 = vpop.f32.mrf.mxu1 }
 0x2f7   : > { %v931_v59 = vsel %vm499_vm3, %v925_v58, -inf }
 0x2f8   : > { %932 = vmax.xlane.f32.xlu0 %v931_v59  ;;  %v1490_v60 = vpop.f32.mrf.mxu1 }
 0x2fa   : > { %v928_v61 = vpop.f32.mrf.mxu1 }
 0x2fc   : > { %v1491_v62 = vpop.f32.mrf.mxu1 }
 0x30e   : > { %688 = vrot.lane.b32.xlu0 %v1956_v30, %s1776_s30 }
 0x315   : > { %803 = vmax.xlane.f32.xlu1 %v802_v63 }
 0x326   : > { %817 = vrot.lane.b32.xlu1 %v1959_v31, %s1777_s12 }
 0x32a   : > { %946 = vrot.lane.b32.xlu1 %v1962_v32, %s1778_s19  ;;  %s1404_s19 = sshll.u32 %s1753_s16, 7  ;;  %s1263_s16 = scalar_lea.sflag [#allocation6], %s377_s17 }
 0x32b   : > { %s2070_s11 = scalar_lea.hbm %s2127_s10, %s1404_s19 }
 0x369   : > { %v548_v1 = vpop.xlane.xlu1 %547 }
 0x36a   : > { %v552_v2 = vsub.f32 %v540_v44, %v548_v1  ;;  %v549_v38 = vsub.f32 -inf, %v548_v1 }
 0x36c   : > { %v553_v3 = vmul.f32 1.442695, %v552_v2  ;;  %v550_v39 = vmul.f32 1.442695, %v549_v38  ;;  %v1389_v38 = vld [vmem:[%s2122_s5] ss:$0 sm:$0xff] }
 0x36d   : > { %v562_v4 = vpop.permute.xlu1 %561 }
 0x36e   : > { %v568_v6 = vsel %vm566_vm4, %v562_v4, 0  ;;  %1627 = vpow2.f32 %v553_v3 }
 0x36f   : > { %1457 = vmatpush3.bf16.msra.mxu0 %v568_v6 }
 0x370   : > { %1468 = vmatprep.subr.bf16.mxu0 %v1766_v5 }
 0x371   : > { %v675_v7 = vpop.xlane.xlu0 %674 }
 0x372   : > { %v679_v8 = vsub.f32 %v667_v49, %v675_v7  ;;  %v676_v45 = vsub.f32 -inf, %v675_v7 }
 0x374   : > { %v680_v9 = vmul.f32 1.442695, %v679_v8  ;;  %v677_v46 = vmul.f32 1.442695, %v676_v45 }
 0x376   : > { %1629 = vpow2.f32 %v680_v9 }
 0x37b   : > { %v1628_v10 = vpop.eup %1627 }
 0x37c   : > { %v560_v11 = vpack.c.bf16 %v1628_v10, %v1628_v10  ;;  %v556_v24 = vsel %vm499_vm3, %v1628_v10, 0.0 }
 0x37e   : > { %1459 = vmatmul.mubr.msk.bf16.vlgmr.msra.gmra.mxu0 %vm499_vm3, %v560_v11 }
 0x37f   : > { %1470 = vmatprep.mubr.msk.bf16.mxu0 %vm1767_vm1, %v1766_v5 }
 0x381   : > { %v933_v12 = vpop.xlane.xlu0 %932 }
 0x382   : > { %v937_v13 = vsub.f32 %v925_v58, %v933_v12  ;;  %v934_v36 = vsub.f32 -inf, %v933_v12 }
 0x383   : > { %v1630_v14 = vpop.eup %1629 }
 0x384   : > { %v938_v15 = vmul.f32 1.442695, %v937_v13  ;;  %v683_v17 = vsel %vm499_vm3, %v1630_v14, 0.0  ;;  %v687_v21 = vpack.c.bf16 %v1630_v14, %v1630_v14  ;;  %v935_v37 = vmul.f32 1.442695, %v934_v36 }
 0x385   : > { %v689_v19 = vpop.permute.xlu0 %688  ;;  %684 = vadd.xlane.f32.xlu0 %v683_v17 }
 0x386   : > { %v694_v20 = vsel %vm566_vm4, %v689_v19, 0  ;;  %1631 = vpow2.f32 %v938_v15 }
 0x387   : > { %1469 = vmatpush3.bf16.msra.mxu0 %v694_v20  ;;  %v1617_v20 = vld [vmem:[%s2121_s4 + $0x8] sm:$0xff]  }
 0x388   : > { %1480 = vmatprep.subr.bf16.mxu0 %v1766_v5  ;;  %1499 = vmatpush3.bf16.msra.mxu1 %v1617_v20 }
 0x389   : > { %1500 = vmatprep.subr.bf16.mxu1 %v1766_v5 }
 0x38a   : > { %1471 = vmatmul.mubr.msk.bf16.vlgmr.msra.gmra.mxu0 %vm499_vm3, %v687_v21 }
 0x38b   : > { %1482 = vmatprep.mubr.msk.bf16.mxu0 %vm1767_vm1, %v1766_v5 }
 0x393   : > { %v1632_v22 = vpop.eup %1631 }
 0x394   : > { %v941_v23 = vsel %vm499_vm3, %v1632_v22, 0.0  ;;  %v945_v35 = vpack.c.bf16 %v1632_v22, %v1632_v22 }
 0x395   : > { %942 = vadd.xlane.f32.xlu0 %v941_v23  ;;  %v1618_v23 = vld [vmem:[%s2121_s4] sm:$0xff]  }
 0x396   : > { %1501 = vmatpush3.bf16.msra.mxu1 %v1618_v23 }
 0x397   : > { %1514 = vmatprep.subr.bf16.mxu1 %v1766_v5 }
 0x399   : > { %557 = vadd.xlane.f32.xlu0 %v556_v24 }
 0x39e   : > { %v804_v25 = vpop.xlane.xlu1 %803 }
 0x39f   : > { %v808_v26 = vsub.f32 %v796_v54, %v804_v25  ;;  %v805_v63 = vsub.f32 -inf, %v804_v25 }
 0x3a1   : > { %v809_v27 = vmul.f32 1.442695, %v808_v26  ;;  %v806_v7 = vmul.f32 1.442695, %v805_v63  ;;  %v1622_v63 = vld [vmem:[%s2125_s8 + $0x10] sm:$0xff]  }
 0x3a2   : > { %v818_v28 = vpop.permute.xlu1 %817 }
 0x3a3   : > { %v823_v29 = vsel %vm566_vm4, %v818_v28, 0  ;;  %1633 = vpow2.f32 %v809_v27 }
 0x3a4   : > { %1481 = vmatpush3.bf16.msra.mxu0 %v823_v29  ;;  %1635 = vpow2.f32 %v935_v37 }
 0x3a5   : > { %1492 = vmatprep.subr.bf16.mxu0 %v1766_v5  ;;  %1637 = vpow2.f32 %v550_v39 }
 0x3a6   : > { %v947_v31 = vpop.permute.xlu1 %946  ;;  %1639 = vpow2.f32 %v677_v46 }
 0x3a7   : > { %v952_v34 = vsel %vm566_vm4, %v947_v31, 0 }
 0x3b0   : > { %v1634_v30 = vpop.eup %1633 }
 0x3b1   : > { %v812_v32 = vsel %vm499_vm3, %v1634_v30, 0.0  ;;  %v816_v33 = vpack.c.bf16 %v1634_v30, %v1634_v30  ;;  %v1636_v40 = vpop.eup %1635 }
 0x3b2   : > { %813 = vadd.xlane.f32.xlu1 %v812_v32  ;;  %v940_v42 = vmul.f32 0.0, %v1636_v40  ;;  %v1638_v47 = vpop.eup %1637 }
 0x3b3   : > { %1483 = vmatmul.mubr.msk.bf16.vlgmr.msra.gmra.mxu0 %vm499_vm3, %v816_v33  ;;  %v555_v49 = vmul.f32 0.0, %v1638_v47  ;;  %v1640_v51 = vpop.eup %1639 }
 0x3b4   : > { %1493 = vmatpush3.bf16.msra.mxu0 %v952_v34  ;;  %1494 = vmatprep.mubr.msk.bf16.mxu0 %vm1767_vm1, %v1766_v5  ;;  %v682_v52 = vmul.f32 0.0, %v1640_v51 }
 0x3b5   : > { %1506 = vmatprep.subr.bf16.mxu0 %v1766_v5 }
 0x3bb   : > { %1495 = vmatmul.mubr.msk.bf16.vlgmr.msra.gmra.mxu0 %vm499_vm3, %v945_v35 }
 0x3bc   : > { %1510 = vmatprep.mubr.msk.bf16.mxu0 %vm1767_vm1, %v1766_v5 }
 0x40e   : > { %v685_v41 = vpop.xlane.xlu0 %684 }
 0x40f   : > { %v686_v53 = vadd.f32 %v685_v41, %v682_v52 }
 0x41e   : > { %v943_v43 = vpop.xlane.xlu0 %942 }
 0x41f   : > { %v944_v44 = vadd.f32 %v943_v43, %v940_v42 }
 0x422   : > { %v558_v48 = vpop.xlane.xlu0 %557 }
 0x423   : > { %v559_v50 = vadd.f32 %v558_v48, %v555_v49  ;;  %v1619_v48 = vld [vmem:[#allocation4 + $0x8] sm:$0xff]  }
 0x424   : > { %1507 = vmatpush3.bf16.msra.mxu0 %v1619_v48 }
 0x425   : > { %1641 = vrcp.f32 %v559_v50  ;;  %1508 = vmatprep.subr.bf16.mxu0 %v1766_v5 }
 0x426   : > { %1643 = vrcp.f32 %v686_v53 }
 0x427   : > { %1645 = vpow2.f32 %v806_v7 }
 0x432   : > { %v1642_v56 = vpop.eup %1641 }
 0x433   : > { %v1644_v2 = vpop.eup %1643 }
 0x434   : > { %v1646_v10 = vpop.eup %1645 }
 0x435   : > { %v811_v12 = vmul.f32 0.0, %v1646_v10 }
 0x43b   : > { %v814_v11 = vpop.xlane.xlu1 %813 }
 0x43c   : > { %v815_v13 = vadd.f32 %v814_v11, %v811_v12 }
 0x43e   : > { %v604_v54 = vpop.f32.mrf.mxu0  ;;  %1647 = vrcp.f32 %v815_v13  ;;  %v1397_v13 = vld [vmem:[%s2126_s9] ss:$0 sm:$0xff] }
 0x43f   : > { %v610_v55 = vadd.f32 %v604_v54, %v555_v49  ;;  %1649 = vrcp.f32 %v944_v44  ;;  %v1620_v49 = vld [vmem:[#allocation4] sm:$0xff]  }
 0x440   : > { %v1460_v57 = vpop.f32.mrf.mxu0  ;;  %1509 = vmatpush3.bf16.msra.mxu0 %v1620_v49 }
 0x441   : > { %v612_v58 = vmul.f32 %v1642_v56, %v610_v55 }
 0x442   : > { %v607_v59 = vpop.f32.mrf.mxu0 }
 0x443   : > { %v613_v60 = vpack.c.bf16 %v612_v58, %v612_v58 }
 0x444   : > { %v1461_v61 = vpop.f32.mrf.mxu0 }
 0x445   : > { %615 = vst.msk [vmem:[#allocation3] sm:$0xf] %vm614_vm5, %v613_v60 }
 0x44a   : > { %v730_v62 = vpop.f32.mrf.mxu0 }
 0x44b   : > { %v736_v1 = vadd.f32 %v730_v62, %v682_v52  ;;  %v1648_v17 = vpop.eup %1647  ;;  %v1621_v62 = vld [vmem:[%s2125_s8 + $0x18] sm:$0xff]  }
 0x44c   : > { %v1472_v3 = vpop.f32.mrf.mxu0  ;;  %v1650_v28 = vpop.eup %1649 }
 0x44d   : > { %v738_v4 = vmul.f32 %v1644_v2, %v736_v1  ;;  %v1393_v1 = vld [vmem:[%s2124_s7] ss:$0 sm:$0xff] }
 0x44e   : > { %v733_v6 = vpop.f32.mrf.mxu0 }
 0x44f   : > { %v1407_v8 = vpack.c.bf16 %v738_v4, %v738_v4 }
 0x450   : > { %v1473_v9 = vpop.f32.mrf.mxu0 }
 0x451   : > { %743 = vrot.lane.b32.xlu1 %v1407_v8, %s1779_s20  ;;  %s379_s20 = scalar_lea.vmem [#allocation7], %s1368_s21 }
 0x452   : > { %s1277_s22 = sshll.u32 %s379_s20, 4  ;;  %s2072_s22 = int_to_ptr.vmem [resolvable:$true] %s1277_s22 }
 0x473   : > { %v859_v14 = vpop.f32.mrf.mxu0 }
 0x474   : > { %v865_v15 = vadd.f32 %v859_v14, %v811_v12 }
 0x475   : > { %v1484_v19 = vpop.f32.mrf.mxu0 }
 0x476   : > { %v867_v21 = vmul.f32 %v1648_v17, %v865_v15 }
 0x477   : > { %v862_v22 = vpop.f32.mrf.mxu0 }
 0x478   : > { %v1408_v24 = vpack.c.bf16 %v867_v21, %v867_v21 }
 0x479   : > { %v1485_v25 = vpop.f32.mrf.mxu0 }
 0x47a   : > { %872 = vrot.lane.b32.xlu0 %v1408_v24, %s1780_s27  ;;  %s1681_s27 = scalar_lea.vmem %s2072_s22, 128 }
 0x47b   : > { %v988_v26 = vpop.f32.mrf.mxu0  ;;  %p1682_p10 = scmp.ne.s32.totalorder %s2072_s22, %s1681_s27 }
 0x47c   : > { %v994_v27 = vadd.f32 %v988_v26, %v940_v42 }
 0x47d   : > { %v1496_v29 = vpop.f32.mrf.mxu0  ;;  %p1683_p11 = pnand %p1682_p10, %p1878_p4 }
 0x47e   : > { %v996_v30 = vmul.f32 %v1650_v28, %v994_v27 }
 0x47f   : > { %v991_v31 = vpop.f32.mrf.mxu0  ;;  %p1684_p13 = pneg %p1683_p11 }
 0x480   : > { %v1409_v32 = vpack.c.bf16 %v996_v30, %v996_v30 }
 0x481   : > { %v1497_v33 = vpop.f32.mrf.mxu0 }
 0x482   : > { %1001 = vrot.lane.b32.xlu1 %v1409_v32, %s1781_s28  ;;  %s1782_s28 = smov [#allocation7]  }
 0x483   : > { %s1685_s21 = sshll.u32 %s1782_s28, 4  ;;  %s1686_s21 = int_to_ptr.vmem [resolvable:$false] %s1685_s21 }
 0x484   : > { %s1687_s30 = scalar_lea.vmem %s1686_s21, 256  ;;  %p1688_p0 = scmp.lt.s32.totalorder %s2072_s22, %s1686_s21 }
 0x485   : > { %p1689_p1 = scmp.lt.s32.totalorder %s1687_s30, %s1681_s27 }
 0x487   : > { %p1690_p2 = por %p1689_p1, %p1688_p0 }
 0x489   : > { %p1691_p3 = pnand %p1690_p2, %p1684_p13 }
 0x4c3   : > { %v744_v34 = vpop.permute.xlu1 %743 }
 0x4c4   : > { %747 = vst.msk [vmem:[#allocation3] sm:$0xf] %vm746_vm6, %v744_v34 }
 0x4ec   : > { %v873_v35 = vpop.permute.xlu0 %872 }
 0x4ed   : > { %876 = vst.msk [vmem:[#allocation3] sm:$0xf] %vm875_vm7, %v873_v35 }
 0x4f4   : > { %v1002_v36 = vpop.permute.xlu1 %1001 }
 0x4f5   : > { %1005 = vst.msk [vmem:[#allocation3] sm:$0xf] %vm1004_vm8, %v1002_v36 }
 0x4fc   : > { %v1006_v37 = vld [vmem:[#allocation3] sm:$0xf] }
 0x4fd   : > { %1503 = vmatmul.mubr.msk.bf16.vlgmr.msra.gmra.mxu1 %vm392_vm0, %v1006_v37 }
 0x4fe   : > { %1522 = vmatprep.mubr.msk.bf16.mxu1 %vm1767_vm1, %v1766_v5  ;;  %1515 = vmatpush3.bf16.msra.mxu1 %v1621_v62 }
 0x4ff   : > { %1516 = vmatprep.subr.bf16.mxu1 %v1766_v5 }
 0x502   : > { %1517 = vmatpush3.bf16.msra.mxu1 %v1622_v63 }
 0x503   : > { %1518 = vmatprep.subr.bf16.mxu1 %v1766_v5 }
 0x5bd   : > { %v1068_v39 = vpop.f32.mrf.mxu1 }
 0x5be   : > { %v1069_v40 = vadd.f32 %v1389_v38, %v1068_v39 }
 0x5bf   : > { %v1504_v41 = vpop.f32.mrf.mxu1 }
 0x5c0   : > { %v2031_v42 = vadd.f32 %v1069_v40, %v1919_v0 }
 0x5c1   : > { %v1071_v43 = vpop.f32.mrf.mxu1 }
 0x5c2   : > { %v1075_v44 = vsel %vm392_vm0, %v2031_v42, 0.0  ;;  %v1079_v45 = vmul.f32 %v2031_v42, %v2031_v42 }
 0x5c3   : > { %1076 = vadd.xlane.f32.xlu1 %v1075_v44  ;;  %v1505_v46 = vpop.f32.mrf.mxu1 }
 0x5c4   : > { %v1080_v47 = vsel %vm392_vm0, %v1079_v45, 0.0 }
 0x5c5   : > { %1081 = vadd.xlane.f32.xlu0 %v1080_v47 }
 0x64c   : > { %v1077_v0 = vpop.xlane.xlu1 %1076 }
 0x64d   : > { %v1078_v50 = vmul.f32 0.03125, %v1077_v0 }
 0x64e   : > { %v1082_v51 = vpop.xlane.xlu0 %1081 }
 0x64f   : > { %v1084_v52 = vmul.f32 %v1078_v50, %v1078_v50  ;;  %v1083_v53 = vmul.f32 0.03125, %v1082_v51  ;;  %v1086_v56 = vsub.f32 %v2031_v42, %v1078_v50 }
 0x651   : > { %v1085_v54 = vsub.f32 %v1083_v53, %v1084_v52 }
 0x653   : > { %v1087_v55 = vadd.f32 1e-05, %v1085_v54 }
 0x655   : > { %1651 = vrsqrt.f32 %v1087_v55 }
 0x662   : > { %v1652_v57 = vpop.eup %1651 }
 0x663   : > { %v1089_v58 = vmul.f32 %v1652_v57, %v1086_v56 }
 0x665   : > { %v1096_v59 = vmul.f32 %v1944_v16, %v1089_v58  ;;  %v1623_v16 = vld [vmem:[%s2125_s8 + $0x8] sm:$0xff]  }
 0x666   : > { %1519 = vmatpush3.bf16.msra.mxu1 %v1623_v16 }
 0x667   : > { %v1103_v60 = vadd.f32 %v1949_v18, %v1096_v59  ;;  %1520 = vmatprep.subr.bf16.mxu1 %v1766_v5  ;;  %v1624_v18 = vld [vmem:[%s2125_s8] sm:$0xff]  }
 0x669   : > { %v1104_v61 = vpack.c.bf16 %v1103_v60, %v1103_v60 }
 0x66a   : > { %1521 = vmatpush3.bf16.msra.mxu1 %v1624_v18 }
 0x66b   : > { %1511 = vmatmul.mubr.msk.bf16.vlgmr.msra.gmra.mxu0 %vm392_vm0, %v1104_v61 }
 0x72b   : > { %v1165_v2 = vpop.f32.mrf.mxu0 }
 0x72c   : > { %v1166_v3 = vadd.f32 %v1393_v1, %v1165_v2 }
 0x72d   : > { %v1512_v4 = vpop.f32.mrf.mxu0 }
 0x72e   : > { %v1172_v6 = vmul.f32 0.70710677, %v1166_v3  ;;  %v1171_v5 = vmul.f32 0.5, %v1166_v3 }
 0x72f   : > { %v1168_v7 = vpop.f32.mrf.mxu0 }
 0x730   : > { %1653 = verf.f32 %v1172_v6 }
 0x731   : > { %v1513_v8 = vpop.f32.mrf.mxu0 }
 0x73d   : > { %v1654_v9 = vpop.eup %1653 }
 0x73e   : > { %v1174_v10 = vadd.f32 1.0, %v1654_v9 }
 0x740   : > { %v1175_v11 = vmul.f32 %v1174_v10, %v1171_v5 }
 0x742   : > { %v1176_v12 = vpack.c.bf16 %v1175_v11, %v1175_v11 }
 0x744   : > { %1523 = vmatmul.mubr.msk.bf16.vlgmr.msra.gmra.mxu1 %vm1216_vm9, %v1176_v12 }
 0x804   : > { %v1254_v14 = vpop.f32.mrf.mxu1 }
 0x805   : > { %v1255_v15 = vadd.f32 %v1397_v13, %v1254_v14 }
 0x806   : > { %v1524_v17 = vpop.f32.mrf.mxu1 }
 0x807   : > { %v1260_v19 = vadd.f32 %v1255_v15, %v2031_v42 }
 0x808   : > { %v1257_v20 = vpop.f32.mrf.mxu1 }
 0x809   : > { %1261 = vst.msk [vmem:[%s379_s20] sm:$0xff] %vm392_vm0, %v1260_v19 }
 0x80a   : > { %v1525_v21 = vpop.f32.mrf.mxu1 }
 0x80b   : > { %1694 = shalt.err (!%p1691_p3)
}
 0x80c   : > { %s1695_s12 = scalar_lea.hbm %s2070_s11, 128  ;;  %s1699_s20 = scalar_lea.hbm %s2127_s10, 256 }
 0x80d   : > { %p1696_p5 = scmp.ne.s32.totalorder %s2070_s11, %s1695_s12  ;;  %p1700_p9 = scmp.lt.s32.totalorder %s2070_s11, %s2127_s10 }
 0x80e   : > { %p1701_p12 = scmp.lt.s32.totalorder %s1699_s20, %s1695_s12 }
 0x80f   : > { %p1697_p6 = pnand %p1696_p5, %p1878_p4 }
 0x810   : > { %p1702_p10 = por %p1701_p12, %p1700_p9 }
 0x811   : > { %p1698_p7 = pneg %p1697_p6 }
 0x813   : > { %p1703_p11 = pnand %p1702_p10, %p1698_p7 }
 0x815   : > { %1706 = shalt.err (!%p1703_p11)
}
 0x816   : > { %1530 = dma.vmem_to_hbm [thread:$0]  (%p1878_p4), %s2072_s22, 128, %s2070_s11, %s1263_s16  }
 0x817 PF: > { %p1542_p13 = scmp.ge.s32.totalorder %s1761_s18, 2  ;;  %s1289_s27 = sand.u32 1, %s1741_s13  }
 0x818   : > { %s1290_s28 = scalar_lea.sflag [#allocation6], %s1289_s27 }
 0x819   : > { %p1537_p0 = pnand %p1542_p13, %p1885_p8 }
 0x81b   : > { %p1538_p1 = pneg %p1537_p0 }
 0x81d   : > { %1736 = dma.done.wait (%p1538_p1), %s1290_s28, 128  }
 0x81e   : > { %1738 = vsyncadd (%p1538_p1), %s1290_s28, 4294967168  ;;  %s24_s18 = sadd.s32 1, %s1761_s18   ;;  %s2136_s16 = sld [smem:[#allocation10_spill]] }
 0x81f   : > { %p21_p2 = scmp.ge.s32.totalorder %s24_s18, 4   ;;  %s2137_s17 = sld [smem:[#allocation11_spill]] }
 0x820   : > { %s2138_s13 = smov %s1745_s14  ;;  %s2139_s14 = smov %s1749_s15 }
 0x821   : > { %s2140_s15 = smov %s1891_s26  ;;  %23 = sbr.rel (!%p21_p2) target bundleno = 5 (0x5), region = 106 }
 0x826   :  { %1295 = vsyncpa [#allocation5], 1 }
 0x827   :  { %1297 = vsyncpa [#allocation5 + $0x1], 1 }
 0x828   :  { %1298 = vsyncpa [#allocation6], 1 }
 0x829   :  { %1300 = vsyncpa [#allocation6 + $0x1], 1 }

// kernel: tpu_custom_call.1
= control target key start
LH: loop header
LB: loop body
LE: loop exit
PB: predicated region body
PF: predicated region fallthrough
CT: control target
= control target key end

     0   :  { %15 = vsyncpa [#allocation5], 0  ;;  %s2117_s0 = inlined_call_operand.vmem [shape: f32[2,8,32], index: 0, kind: input, shape index: {}]   ;;  %s2118_s1 = inlined_call_operand.vmem [shape: f32[1,32], index: 1, kind: input, shape index: {}]   ;;  %s2119_s2 = inlined_call_operand.vmem [shape: f32[1,32], index: 2, kind: input, shape index: {}]   ;;  %s2120_s3 = inlined_call_operand.vmem [shape: bf16[32,96], index: 3, kind: input, shape index: {}]   ;;  %s2121_s4 = inlined_call_operand.vmem [shape: bf16[32,32], index: 4, kind: input, shape index: {}]   ;;  %s2122_s5 = inlined_call_operand.vmem [shape: f32[1,32], index: 5, kind: input, shape index: {}]   ;;  %s2123_s6 = inlined_call_operand.hbm [shape: bf16[32,64], index: 6, kind: input, shape index: {}]   ;;  %s2124_s7 = inlined_call_operand.vmem [shape: f32[1,64], index: 7, kind: input, shape index: {}]   ;;  %s2125_s8 = inlined_call_operand.vmem [shape: bf16[64,32], index: 8, kind: input, shape index: {}]   ;;  %s2126_s9 = inlined_call_operand.vmem [shape: f32[1,32], index: 9, kind: input, shape index: {}]   ;;  %s2127_s10 = inlined_call_operand.hbm [shape: f32[2,8,32], index: 10, kind: output, shape index: {}]  }
   0x1   :  { %16 = vsyncpa [#allocation6], 0 }
   0x2   :  { %18 = vsyncpa [#allocation6 + $0x1], 0  ;;  %s1838_s13 = smov 0   ;;  %s1840_s14 = smov 0  }
   0x3   :  { %s1842_s15 = smov 0   ;;  %s1844_s16 = smov 0  }
   0x4   :  { %s1846_s17 = smov 0   ;;  %s1848_s18 = smov 0  }
   0x5 LB: > { %2130 = sst [smem:[#allocation10_spill]] %s1757_s17  ;;  %s1361_s19 = sadd.s32 4294967295, %s1761_s18   ;;  %s1761_s18 = sphi %s1848_s18, %s24_s18   ;;  %s1757_s17 = sphi %s1846_s17, %s2137_s17   ;;  %s1753_s16 = sphi %s1844_s16, %s2136_s16   ;;  %s1749_s15 = sphi %s1842_s15, %s2140_s15   ;;  %s1745_s14 = sphi %s1840_s14, %s2139_s14   ;;  %s1741_s13 = sphi %s1838_s13, %s2138_s13  }
   0x6   : > { %s1362_s20 = sadd.s32 4294967294, %s1761_s18   ;;  %s36_s21 = sadd.s32 1, %s1757_s17 }
   0x7   : > { %s260_s22 = sadd.s32 1, %s1749_s15  ;;  %p38_p0 = scmp.ge.s32.totalorder %s36_s21, 2 }
   0x8   : > { %p270_p1 = scmp.ne.s32.totalorder %s1749_s15, %s1745_s14  ;;  %p271_p2 = scmp.eq.s32.totalorder %s1361_s19, 1 }
   0x9   : > { %p276_p3 = scmp.ne.s32.totalorder %s1745_s14, %s1741_s13  ;;  %s2142_s21 = smov (%p38_p0, %s36_s21), 0 }
   0xa   : > { %2131 = sst [smem:[#allocation11_spill]] %s2142_s21  ;;  %p1878_p4 = por %p271_p2, %p270_p1 }
   0xb   : > { %p277_p5 = scmp.eq.s32.totalorder %s1362_s20, 1  ;;  %s255_s24 = ssub.s32 %s1757_s17, %s2142_s21 }
   0xc   : > { %p1363_p6 = scmp.ge.s32.totalorder %s1761_s18, 1  ;;  %p258_p7 = scmp.eq.s32.totalorder %s255_s24, 0 }
   0xd   : > { %p1885_p8 = por %p277_p5, %p276_p3  ;;  %p284_p9 = scmp.lt.s32.totalorder %s1761_s18, 3 }
   0xe   : > { %s1891_s26 = scalar_select %p258_p7, %s1749_s15, %s260_s22  }
   0xf   : > { %p1893_p10 = pnand %p1363_p6, %p284_p9  ;;  %p1897_p11 = scmp.eq.s32.totalorder %s1361_s19, 0 }
  0x10   : > { %s1763_s29 = smov [#allocation4]  }
  0x11   : > { %p1532_p12 = pneg %p1893_p10  ;;  %s311_s30 = sshll.u32 %s1763_s29, 4  ;;  %s312_s30 = int_to_ptr.vmem [resolvable:$true] %s311_s30 }
  0x12   : > { %s1666_s11 = scalar_lea.vmem %s312_s30, 256  ;;  %p1674_p5 = scmp.lt.s32.totalorder %s312_s30, %s312_s30 }
  0x13   : > { %p1533_p13 = pnand %p1897_p11, %p1532_p12  ;;  %p1667_p1 = scmp.ne.s32.totalorder %s312_s30, %s1666_s11 }
  0x14   : > { %p1675_p6 = scmp.lt.s32.totalorder %s1666_s11, %s1666_s11 }
  0x15   : > { %p1657_p0 = pneg %p1533_p13 }
  0x16   : > { %p1676_p7 = por %p1675_p6, %p1674_p5 }
  0x17   : > { %p1669_p2 = pnand %p1667_p1, %p1657_p0 }
  0x19   : > { %p1670_p3 = pneg %p1669_p2 }
  0x1b   : > { %p1677_p9 = pnand %p1676_p7, %p1670_p3 }
  0x1d   : > { %1680 = shalt.err (!%p1677_p9)
}
  0x1e   : > { %s1764_s12 = smov 64   ;;  %s1765_s19 = smov 4  }
  0x1f   : > { %1535 = dma.hbm_to_vmem [thread:$0]  (!%p1533_p13), %s2123_s6, 256, %s312_s30, [#allocation5], %s1764_s12, %s1764_s12, %s1765_s19  }
  0x20   : > { %343 = sbr.rel (%p1893_p10) target bundleno = 2071 (0x817), region = 60 }
  0x25   : > { %1732 = dma.done.wait (%p1897_p11), [#allocation5], 256  }
  0x26   : > { %1734 = vsyncadd (%p1897_p11), [#allocation5], 4294967040  ;;  %p380_p12 = scmp.lt.s32.totalorder %s1753_s16, 1  ;;  %vm392_vm0 = vcmask 261120   ;;  %v1610_v4 = vld [vmem:[%s2120_s3 + $0x8] sm:$0xff]   ;;  %v1766_v5 = vmov 0.0  }
  0x27   : > { %1442 = vmatprep.subr.bf16.mxu0 %v1766_v5  ;;  %vm1767_vm1 = vmmov 0   ;;  %v1611_v6 = vld [vmem:[%s2120_s3] sm:$0xff]   ;;  %1450 = vmatprep.subr.bf16.mxu1 %v1766_v5  ;;  %vm483_vm2 = vcmask 781312   ;;  %s1768_s22 = smov 96   ;;  %s1771_s11 = smov 80   ;;  %vm499_vm3 = vcmask 64512  }
  0x28   : > { %s381_s24 = scalar_select %p380_p12, %s1753_s16, 1  ;;  %1446 = vmatprep.mubr.msk.bf16.mxu0 %vm1767_vm1, %v1766_v5  ;;  %1443 = vmatpush3.bf16.msra.mxu0 %v1610_v4  ;;  %v1944_v16 = vld [vmem:[%s2118_s1] ss:$0 sm:$0xff]  ;;  %vm566_vm4 = vcmask 1043456   ;;  %vm614_vm5 = vcmask 60416   ;;  %vm746_vm6 = vcmask 126016  }
  0x29   : > { %1444 = vmatprep.subr.bf16.mxu0 %v1766_v5  ;;  %1452 = vmatprep.mubr.msk.bf16.mxu1 %vm1767_vm1, %v1766_v5  ;;  %v1949_v18 = vld [vmem:[%s2119_s2] ss:$0 sm:$0xff]  ;;  %s1772_s27 = smov 112   ;;  %s1773_s28 = smov 72   ;;  %vm875_vm7 = vcmask 191616   ;;  %vm1004_vm8 = vcmask 257216  }
  0x2a   : > { %s1369_s29 = sshll.u32 %s381_s24, 3  ;;  %s1769_s24 = smov 120   ;;  %vm1216_vm9 = vcmask 523264  }
  0x2b   : > { %s383_s17 = scalar_lea.vmem %s2117_s0, %s1369_s29  ;;  %s1770_s29 = smov 88  }
  0x2c   : > { %v1919_v0 = vld [vmem:[%s383_s17] sm:$0xff]  ;;  %1445 = vmatpush3.bf16.msra.mxu0 %v1611_v6  ;;  %s1774_s17 = smov 104   ;;  %s1775_s21 = smov 64  }
  0x2d   : > { %v393_v1 = vsel %vm392_vm0, %v1919_v0, 0.0  ;;  %v397_v2 = vmul.f32 %v1919_v0, %v1919_v0  ;;  %1456 = vmatprep.subr.bf16.mxu0 %v1766_v5  ;;  %s1776_s30 = smov 56   ;;  %s1777_s12 = smov 48  }
  0x2e   : > { %394 = vadd.xlane.f32.xlu0 %v393_v1  ;;  %s1778_s19 = smov 40   ;;  %s1779_s20 = smov 8  }
  0x2f   : > { %v398_v3 = vsel %vm392_vm0, %v397_v2, 0.0 }
  0x32   : > { %399 = vadd.xlane.f32.xlu0 %v398_v3 }
  0xb7   : > { %v395_v7 = vpop.xlane.xlu0 %394 }
  0xb8   : > { %v396_v8 = vmul.f32 0.03125, %v395_v7 }
  0xba   : > { %v402_v10 = vmul.f32 %v396_v8, %v396_v8  ;;  %v404_v14 = vsub.f32 %v1919_v0, %v396_v8 }
  0xbb   : > { %v400_v9 = vpop.xlane.xlu0 %399 }
  0xbc   : > { %v401_v11 = vmul.f32 0.03125, %v400_v9 }
  0xbe   : > { %v403_v12 = vsub.f32 %v401_v11, %v402_v10 }
  0xc0   : > { %v405_v13 = vadd.f32 1e-05, %v403_v12 }
  0xc2   : > { %1625 = vrsqrt.f32 %v405_v13 }
  0xcf   : > { %v1626_v15 = vpop.eup %1625 }
  0xd0   : > { %v407_v17 = vmul.f32 %v1626_v15, %v404_v14 }
  0xd2   : > { %v414_v19 = vmul.f32 %v1944_v16, %v407_v17 }
  0xd4   : > { %v421_v20 = vadd.f32 %v1949_v18, %v414_v19 }
  0xd6   : > { %v422_v21 = vpack.c.bf16 %v421_v20, %v421_v20 }
  0xd8   : > { %1447 = vmatmul.mubr.msk.bf16.vlgmr.msra.gmra.mxu0 %vm392_vm0, %v422_v21 }
  0xd9   : > { %1458 = vmatprep.mubr.msk.bf16.mxu0 %vm1767_vm1, %v1766_v5 }
 0x198   : > { %v476_v22 = vpop.f32.mrf.mxu0 }
 0x199   : > { %v482_v23 = vpack.c.bf16 %v476_v22, %v476_v22 }
 0x19a   : > { %v1448_v24 = vpop.f32.mrf.mxu0 }
 0x19b   : > { %484 = vst.msk [vmem:[#allocation2] sm:$0xf] %vm483_vm2, %v482_v23 }
 0x19c   : > { %v479_v25 = vpop.f32.mrf.mxu0 }
 0x19e   : > { %v1449_v26 = vpop.f32.mrf.mxu0 }
 0x1a2   : > { %v1612_v27 = vld [vmem:[#allocation2] ss:$0 sps:$4 sm:$0xff]  }
 0x1a3   : > { %v492_v28 = vld [vmem:[#allocation2] sm:$0xf]  ;;  %497 = vrot.lane.b32.xlu1 %v1612_v27, %s1768_s22 }
 0x1a4   : > { %v1376_v29 = vcombine.low %v492_v28, %v492_v28  ;;  %v1956_v30 = vld [vmem:[#allocation2] ss:$0 sps:$4 sm:$0xff]  }
 0x1a5   : > { %v1959_v31 = vld [vmem:[#allocation2] ss:$0 sps:$4 sm:$0xff]  }
 0x1a6   : > { %620 = vrot.lane.b32.xlu0 %v1376_v29, %s1769_s24  ;;  %v1962_v32 = vld [vmem:[#allocation2] ss:$0 sps:$4 sm:$0xff]  }
 0x1a7   : > { %625 = vrot.lane.b32.xlu1 %v1956_v30, %s1770_s29 }
 0x1ab   : > { %754 = vrot.lane.b32.xlu1 %v1959_v31, %s1771_s11 }
 0x1af   : > { %749 = vrot.lane.b32.xlu1 %v1376_v29, %s1772_s27  ;;  %s1780_s27 = smov 16  }
 0x1b3   : > { %883 = vrot.lane.b32.xlu1 %v1962_v32, %s1773_s28  ;;  %s1781_s28 = smov 24  }
 0x1b7   : > { %878 = vrot.lane.b32.xlu1 %v1376_v29, %s1774_s17  ;;  %s377_s17 = sand.u32 1, %s1745_s14  }
 0x215   : > { %v498_v33 = vpop.permute.xlu1 %497 }
 0x216   : > { %v504_v34 = vsel %vm499_vm3, %v498_v33, 0 }
 0x217   : > { %1451 = vmatpush3.bf16.xpose.msra.mxu1 %v504_v34 }
 0x218   : > { %1462 = vmatprep.subr.bf16.mxu1 %v1766_v5  ;;  %v621_v38 = vpop.permute.xlu0 %620 }
 0x219   : > { %v626_v35 = vpop.permute.xlu1 %625 }
 0x21a   : > { %v631_v36 = vsel %vm499_vm3, %v626_v35, 0 }
 0x21d   : > { %v755_v37 = vpop.permute.xlu1 %754 }
 0x21e   : > { %1453 = vmatmul.mubr.msk.bf16.vlgmr.msra.gmra.mxu1 %vm499_vm3, %v492_v28  ;;  %v760_v40 = vsel %vm499_vm3, %v755_v37, 0 }
 0x21f   : > { %1463 = vmatpush3.bf16.xpose.msra.mxu1 %v631_v36  ;;  %1464 = vmatprep.mubr.msk.bf16.mxu1 %vm1767_vm1, %v1766_v5 }
 0x220   : > { %1474 = vmatprep.subr.bf16.mxu1 %v1766_v5 }
 0x221   : > { %v750_v39 = vpop.permute.xlu1 %749 }
 0x225   : > { %v884_v41 = vpop.permute.xlu1 %883 }
 0x226   : > { %1465 = vmatmul.mubr.msk.bf16.vlgmr.msra.gmra.mxu1 %vm499_vm3, %v621_v38  ;;  %v889_v42 = vsel %vm499_vm3, %v884_v41, 0 }
 0x227   : > { %1475 = vmatpush3.bf16.xpose.msra.mxu1 %v760_v40  ;;  %1476 = vmatprep.mubr.msk.bf16.mxu1 %vm1767_vm1, %v1766_v5 }
 0x228   : > { %1486 = vmatprep.subr.bf16.mxu1 %v1766_v5 }
 0x229   : > { %v879_v43 = vpop.permute.xlu1 %878 }
 0x22e   : > { %1477 = vmatmul.mubr.msk.bf16.vlgmr.msra.gmra.mxu1 %vm499_vm3, %v750_v39 }
 0x22f   : > { %1487 = vmatpush3.bf16.xpose.msra.mxu1 %v889_v42  ;;  %1488 = vmatprep.mubr.msk.bf16.mxu1 %vm1767_vm1, %v1766_v5 }
 0x230   : > { %1498 = vmatprep.subr.bf16.mxu1 %v1766_v5 }
 0x236   : > { %1489 = vmatmul.mubr.msk.bf16.vlgmr.msra.gmra.mxu1 %vm499_vm3, %v879_v43 }
 0x237   : > { %1502 = vmatprep.mubr.msk.bf16.mxu1 %vm1767_vm1, %v1766_v5 }
 0x2de   : > { %v540_v44 = vpop.f32.mrf.mxu1 }
 0x2df   : > { %v546_v45 = vsel %vm499_vm3, %v540_v44, -inf }
 0x2e0   : > { %547 = vmax.xlane.f32.xlu1 %v546_v45  ;;  %v1454_v46 = vpop.f32.mrf.mxu1 }
 0x2e2   : > { %v543_v47 = vpop.f32.mrf.mxu1 }
 0x2e4   : > { %v1455_v48 = vpop.f32.mrf.mxu1 }
 0x2e6   : > { %v667_v49 = vpop.f32.mrf.mxu1 }
 0x2e7   : > { %v673_v50 = vsel %vm499_vm3, %v667_v49, -inf }
 0x2e8   : > { %674 = vmax.xlane.f32.xlu0 %v673_v50  ;;  %v1466_v51 = vpop.f32.mrf.mxu1 }
 0x2ea   : > { %v670_v52 = vpop.f32.mrf.mxu1 }
 0x2ec   : > { %v1467_v53 = vpop.f32.mrf.mxu1 }
 0x2ee   : > { %v796_v54 = vpop.f32.mrf.mxu1 }
 0x2ef   : > { %v802_v63 = vsel %vm499_vm3, %v796_v54, -inf }
 0x2f0   : > { %v1478_v55 = vpop.f32.mrf.mxu1 }
 0x2f1   : > { %561 = vrot.lane.b32.xlu1 %v1612_v27, %s1775_s21  ;;  %s1368_s21 = sshll.u32 %s377_s17, 3 }
 0x2f2   : > { %v799_v56 = vpop.f32.mrf.mxu1 }
 0x2f4   : > { %v1479_v57 = vpop.f32.mrf.mxu1 }
 0x2f6   : > { %v925_v58 = vpop.f32.mrf.mxu1 }
 0x2f7   : > { %v931_v59 = vsel %vm499_vm3, %v925_v58, -inf }
 0x2f8   : > { %932 = vmax.xlane.f32.xlu0 %v931_v59  ;;  %v1490_v60 = vpop.f32.mrf.mxu1 }
 0x2fa   : > { %v928_v61 = vpop.f32.mrf.mxu1 }
 0x2fc   : > { %v1491_v62 = vpop.f32.mrf.mxu1 }
 0x30e   : > { %688 = vrot.lane.b32.xlu0 %v1956_v30, %s1776_s30 }
 0x315   : > { %803 = vmax.xlane.f32.xlu1 %v802_v63 }
 0x326   : > { %817 = vrot.lane.b32.xlu1 %v1959_v31, %s1777_s12 }
 0x32a   : > { %946 = vrot.lane.b32.xlu1 %v1962_v32, %s1778_s19  ;;  %s1404_s19 = sshll.u32 %s1753_s16, 7  ;;  %s1263_s16 = scalar_lea.sflag [#allocation6], %s377_s17 }
 0x32b   : > { %s2070_s11 = scalar_lea.hbm %s2127_s10, %s1404_s19 }
 0x369   : > { %v548_v1 = vpop.xlane.xlu1 %547 }
 0x36a   : > { %v552_v2 = vsub.f32 %v540_v44, %v548_v1  ;;  %v549_v38 = vsub.f32 -inf, %v548_v1 }
 0x36c   : > { %v553_v3 = vmul.f32 1.442695, %v552_v2  ;;  %v550_v39 = vmul.f32 1.442695, %v549_v38  ;;  %v1389_v38 = vld [vmem:[%s2122_s5] ss:$0 sm:$0xff] }
 0x36d   : > { %v562_v4 = vpop.permute.xlu1 %561 }
 0x36e   : > { %v568_v6 = vsel %vm566_vm4, %v562_v4, 0  ;;  %1627 = vpow2.f32 %v553_v3 }
 0x36f   : > { %1457 = vmatpush3.bf16.msra.mxu0 %v568_v6 }
 0x370   : > { %1468 = vmatprep.subr.bf16.mxu0 %v1766_v5 }
 0x371   : > { %v675_v7 = vpop.xlane.xlu0 %674 }
 0x372   : > { %v679_v8 = vsub.f32 %v667_v49, %v675_v7  ;;  %v676_v45 = vsub.f32 -inf, %v675_v7 }
 0x374   : > { %v680_v9 = vmul.f32 1.442695, %v679_v8  ;;  %v677_v46 = vmul.f32 1.442695, %v676_v45 }
 0x376   : > { %1629 = vpow2.f32 %v680_v9 }
 0x37b   : > { %v1628_v10 = vpop.eup %1627 }
 0x37c   : > { %v560_v11 = vpack.c.bf16 %v1628_v10, %v1628_v10  ;;  %v556_v24 = vsel %vm499_vm3, %v1628_v10, 0.0 }
 0x37e   : > { %1459 = vmatmul.mubr.msk.bf16.vlgmr.msra.gmra.mxu0 %vm499_vm3, %v560_v11 }
 0x37f   : > { %1470 = vmatprep.mubr.msk.bf16.mxu0 %vm1767_vm1, %v1766_v5 }
 0x381   : > { %v933_v12 = vpop.xlane.xlu0 %932 }
 0x382   : > { %v937_v13 = vsub.f32 %v925_v58, %v933_v12  ;;  %v934_v36 = vsub.f32 -inf, %v933_v12 }
 0x383   : > { %v1630_v14 = vpop.eup %1629 }
 0x384   : > { %v938_v15 = vmul.f32 1.442695, %v937_v13  ;;  %v683_v17 = vsel %vm499_vm3, %v1630_v14, 0.0  ;;  %v687_v21 = vpack.c.bf16 %v1630_v14, %v1630_v14  ;;  %v935_v37 = vmul.f32 1.442695, %v934_v36 }
 0x385   : > { %v689_v19 = vpop.permute.xlu0 %688  ;;  %684 = vadd.xlane.f32.xlu0 %v683_v17 }
 0x386   : > { %v694_v20 = vsel %vm566_vm4, %v689_v19, 0  ;;  %1631 = vpow2.f32 %v938_v15 }
 0x387   : > { %1469 = vmatpush3.bf16.msra.mxu0 %v694_v20  ;;  %v1617_v20 = vld [vmem:[%s2121_s4 + $0x8] sm:$0xff]  }
 0x388   : > { %1480 = vmatprep.subr.bf16.mxu0 %v1766_v5  ;;  %1499 = vmatpush3.bf16.msra.mxu1 %v1617_v20 }
 0x389   : > { %1500 = vmatprep.subr.bf16.mxu1 %v1766_v5 }
 0x38a   : > { %1471 = vmatmul.mubr.msk.bf16.vlgmr.msra.gmra.mxu0 %vm499_vm3, %v687_v21 }
 0x38b   : > { %1482 = vmatprep.mubr.msk.bf16.mxu0 %vm1767_vm1, %v1766_v5 }
 0x393   : > { %v1632_v22 = vpop.eup %1631 }
 0x394   : > { %v941_v23 = vsel %vm499_vm3, %v1632_v22, 0.0  ;;  %v945_v35 = vpack.c.bf16 %v1632_v22, %v1632_v22 }
 0x395   : > { %942 = vadd.xlane.f32.xlu0 %v941_v23  ;;  %v1618_v23 = vld [vmem:[%s2121_s4] sm:$0xff]  }
 0x396   : > { %1501 = vmatpush3.bf16.msra.mxu1 %v1618_v23 }
 0x397   : > { %1514 = vmatprep.subr.bf16.mxu1 %v1766_v5 }
 0x399   : > { %557 = vadd.xlane.f32.xlu0 %v556_v24 }
 0x39e   : > { %v804_v25 = vpop.xlane.xlu1 %803 }
 0x39f   : > { %v808_v26 = vsub.f32 %v796_v54, %v804_v25  ;;  %v805_v63 = vsub.f32 -inf, %v804_v25 }
 0x3a1   : > { %v809_v27 = vmul.f32 1.442695, %v808_v26  ;;  %v806_v7 = vmul.f32 1.442695, %v805_v63  ;;  %v1622_v63 = vld [vmem:[%s2125_s8 + $0x10] sm:$0xff]  }
 0x3a2   : > { %v818_v28 = vpop.permute.xlu1 %817 }
 0x3a3   : > { %v823_v29 = vsel %vm566_vm4, %v818_v28, 0  ;;  %1633 = vpow2.f32 %v809_v27 }
 0x3a4   : > { %1481 = vmatpush3.bf16.msra.mxu0 %v823_v29  ;;  %1635 = vpow2.f32 %v935_v37 }
 0x3a5   : > { %1492 = vmatprep.subr.bf16.mxu0 %v1766_v5  ;;  %1637 = vpow2.f32 %v550_v39 }
 0x3a6   : > { %v947_v31 = vpop.permute.xlu1 %946  ;;  %1639 = vpow2.f32 %v677_v46 }
 0x3a7   : > { %v952_v34 = vsel %vm566_vm4, %v947_v31, 0 }
 0x3b0   : > { %v1634_v30 = vpop.eup %1633 }
 0x3b1   : > { %v812_v32 = vsel %vm499_vm3, %v1634_v30, 0.0  ;;  %v816_v33 = vpack.c.bf16 %v1634_v30, %v1634_v30  ;;  %v1636_v40 = vpop.eup %1635 }
 0x3b2   : > { %813 = vadd.xlane.f32.xlu1 %v812_v32  ;;  %v940_v42 = vmul.f32 0.0, %v1636_v40  ;;  %v1638_v47 = vpop.eup %1637 }
 0x3b3   : > { %1483 = vmatmul.mubr.msk.bf16.vlgmr.msra.gmra.mxu0 %vm499_vm3, %v816_v33  ;;  %v555_v49 = vmul.f32 0.0, %v1638_v47  ;;  %v1640_v51 = vpop.eup %1639 }
 0x3b4   : > { %1493 = vmatpush3.bf16.msra.mxu0 %v952_v34  ;;  %1494 = vmatprep.mubr.msk.bf16.mxu0 %vm1767_vm1, %v1766_v5  ;;  %v682_v52 = vmul.f32 0.0, %v1640_v51 }
 0x3b5   : > { %1506 = vmatprep.subr.bf16.mxu0 %v1766_v5 }
 0x3bb   : > { %1495 = vmatmul.mubr.msk.bf16.vlgmr.msra.gmra.mxu0 %vm499_vm3, %v945_v35 }
 0x3bc   : > { %1510 = vmatprep.mubr.msk.bf16.mxu0 %vm1767_vm1, %v1766_v5 }
 0x40e   : > { %v685_v41 = vpop.xlane.xlu0 %684 }
 0x40f   : > { %v686_v53 = vadd.f32 %v685_v41, %v682_v52 }
 0x41e   : > { %v943_v43 = vpop.xlane.xlu0 %942 }
 0x41f   : > { %v944_v44 = vadd.f32 %v943_v43, %v940_v42 }
 0x422   : > { %v558_v48 = vpop.xlane.xlu0 %557 }
 0x423   : > { %v559_v50 = vadd.f32 %v558_v48, %v555_v49  ;;  %v1619_v48 = vld [vmem:[#allocation4 + $0x8] sm:$0xff]  }
 0x424   : > { %1507 = vmatpush3.bf16.msra.mxu0 %v1619_v48 }
 0x425   : > { %1641 = vrcp.f32 %v559_v50  ;;  %1508 = vmatprep.subr.bf16.mxu0 %v1766_v5 }
 0x426   : > { %1643 = vrcp.f32 %v686_v53 }
 0x427   : > { %1645 = vpow2.f32 %v806_v7 }
 0x432   : > { %v1642_v56 = vpop.eup %1641 }
 0x433   : > { %v1644_v2 = vpop.eup %1643 }
 0x434   : > { %v1646_v10 = vpop.eup %1645 }
 0x435   : > { %v811_v12 = vmul.f32 0.0, %v1646_v10 }
 0x43b   : > { %v814_v11 = vpop.xlane.xlu1 %813 }
 0x43c   : > { %v815_v13 = vadd.f32 %v814_v11, %v811_v12 }
 0x43e   : > { %v604_v54 = vpop.f32.mrf.mxu0  ;;  %1647 = vrcp.f32 %v815_v13  ;;  %v1397_v13 = vld [vmem:[%s2126_s9] ss:$0 sm:$0xff] }
 0x43f   : > { %v610_v55 = vadd.f32 %v604_v54, %v555_v49  ;;  %1649 = vrcp.f32 %v944_v44  ;;  %v1620_v49 = vld [vmem:[#allocation4] sm:$0xff]  }
 0x440   : > { %v1460_v57 = vpop.f32.mrf.mxu0  ;;  %1509 = vmatpush3.bf16.msra.mxu0 %v1620_v49 }
 0x441   : > { %v612_v58 = vmul.f32 %v1642_v56, %v610_v55 }
 0x442   : > { %v607_v59 = vpop.f32.mrf.mxu0 }
 0x443   : > { %v613_v60 = vpack.c.bf16 %v612_v58, %v612_v58 }
 0x444   : > { %v1461_v61 = vpop.f32.mrf.mxu0 }
 0x445   : > { %615 = vst.msk [vmem:[#allocation3] sm:$0xf] %vm614_vm5, %v613_v60 }
 0x44a   : > { %v730_v62 = vpop.f32.mrf.mxu0 }
 0x44b   : > { %v736_v1 = vadd.f32 %v730_v62, %v682_v52  ;;  %v1648_v17 = vpop.eup %1647  ;;  %v1621_v62 = vld [vmem:[%s2125_s8 + $0x18] sm:$0xff]  }
 0x44c   : > { %v1472_v3 = vpop.f32.mrf.mxu0  ;;  %v1650_v28 = vpop.eup %1649 }
 0x44d   : > { %v738_v4 = vmul.f32 %v1644_v2, %v736_v1  ;;  %v1393_v1 = vld [vmem:[%s2124_s7] ss:$0 sm:$0xff] }
 0x44e   : > { %v733_v6 = vpop.f32.mrf.mxu0 }
 0x44f   : > { %v1407_v8 = vpack.c.bf16 %v738_v4, %v738_v4 }
 0x450   : > { %v1473_v9 = vpop.f32.mrf.mxu0 }
 0x451   : > { %743 = vrot.lane.b32.xlu1 %v1407_v8, %s1779_s20  ;;  %s379_s20 = scalar_lea.vmem [#allocation7], %s1368_s21 }
 0x452   : > { %s1277_s22 = sshll.u32 %s379_s20, 4  ;;  %s2072_s22 = int_to_ptr.vmem [resolvable:$true] %s1277_s22 }
 0x473   : > { %v859_v14 = vpop.f32.mrf.mxu0 }
 0x474   : > { %v865_v15 = vadd.f32 %v859_v14, %v811_v12 }
 0x475   : > { %v1484_v19 = vpop.f32.mrf.mxu0 }
 0x476   : > { %v867_v21 = vmul.f32 %v1648_v17, %v865_v15 }
 0x477   : > { %v862_v22 = vpop.f32.mrf.mxu0 }
 0x478   : > { %v1408_v24 = vpack.c.bf16 %v867_v21, %v867_v21 }
 0x479   : > { %v1485_v25 = vpop.f32.mrf.mxu0 }
 0x47a   : > { %872 = vrot.lane.b32.xlu0 %v1408_v24, %s1780_s27  ;;  %s1681_s27 = scalar_lea.vmem %s2072_s22, 128 }
 0x47b   : > { %v988_v26 = vpop.f32.mrf.mxu0  ;;  %p1682_p10 = scmp.ne.s32.totalorder %s2072_s22, %s1681_s27 }
 0x47c   : > { %v994_v27 = vadd.f32 %v988_v26, %v940_v42 }
 0x47d   : > { %v1496_v29 = vpop.f32.mrf.mxu0  ;;  %p1683_p11 = pnand %p1682_p10, %p1878_p4 }
 0x47e   : > { %v996_v30 = vmul.f32 %v1650_v28, %v994_v27 }
 0x47f   : > { %v991_v31 = vpop.f32.mrf.mxu0  ;;  %p1684_p13 = pneg %p1683_p11 }
 0x480   : > { %v1409_v32 = vpack.c.bf16 %v996_v30, %v996_v30 }
 0x481   : > { %v1497_v33 = vpop.f32.mrf.mxu0 }
 0x482   : > { %1001 = vrot.lane.b32.xlu1 %v1409_v32, %s1781_s28  ;;  %s1782_s28 = smov [#allocation7]  }
 0x483   : > { %s1685_s21 = sshll.u32 %s1782_s28, 4  ;;  %s1686_s21 = int_to_ptr.vmem [resolvable:$false] %s1685_s21 }
 0x484   : > { %s1687_s30 = scalar_lea.vmem %s1686_s21, 256  ;;  %p1688_p0 = scmp.lt.s32.totalorder %s2072_s22, %s1686_s21 }
 0x485   : > { %p1689_p1 = scmp.lt.s32.totalorder %s1687_s30, %s1681_s27 }
 0x487   : > { %p1690_p2 = por %p1689_p1, %p1688_p0 }
 0x489   : > { %p1691_p3 = pnand %p1690_p2, %p1684_p13 }
 0x4c3   : > { %v744_v34 = vpop.permute.xlu1 %743 }
 0x4c4   : > { %747 = vst.msk [vmem:[#allocation3] sm:$0xf] %vm746_vm6, %v744_v34 }
 0x4ec   : > { %v873_v35 = vpop.permute.xlu0 %872 }
 0x4ed   : > { %876 = vst.msk [vmem:[#allocation3] sm:$0xf] %vm875_vm7, %v873_v35 }
 0x4f4   : > { %v1002_v36 = vpop.permute.xlu1 %1001 }
 0x4f5   : > { %1005 = vst.msk [vmem:[#allocation3] sm:$0xf] %vm1004_vm8, %v1002_v36 }
 0x4fc   : > { %v1006_v37 = vld [vmem:[#allocation3] sm:$0xf] }
 0x4fd   : > { %1503 = vmatmul.mubr.msk.bf16.vlgmr.msra.gmra.mxu1 %vm392_vm0, %v1006_v37 }
 0x4fe   : > { %1522 = vmatprep.mubr.msk.bf16.mxu1 %vm1767_vm1, %v1766_v5  ;;  %1515 = vmatpush3.bf16.msra.mxu1 %v1621_v62 }
 0x4ff   : > { %1516 = vmatprep.subr.bf16.mxu1 %v1766_v5 }
 0x502   : > { %1517 = vmatpush3.bf16.msra.mxu1 %v1622_v63 }
 0x503   : > { %1518 = vmatprep.subr.bf16.mxu1 %v1766_v5 }
 0x5bd   : > { %v1068_v39 = vpop.f32.mrf.mxu1 }
 0x5be   : > { %v1069_v40 = vadd.f32 %v1389_v38, %v1068_v39 }
 0x5bf   : > { %v1504_v41 = vpop.f32.mrf.mxu1 }
 0x5c0   : > { %v2031_v42 = vadd.f32 %v1069_v40, %v1919_v0 }
 0x5c1   : > { %v1071_v43 = vpop.f32.mrf.mxu1 }
 0x5c2   : > { %v1075_v44 = vsel %vm392_vm0, %v2031_v42, 0.0  ;;  %v1079_v45 = vmul.f32 %v2031_v42, %v2031_v42 }
 0x5c3   : > { %1076 = vadd.xlane.f32.xlu1 %v1075_v44  ;;  %v1505_v46 = vpop.f32.mrf.mxu1 }
 0x5c4   : > { %v1080_v47 = vsel %vm392_vm0, %v1079_v45, 0.0 }
 0x5c5   : > { %1081 = vadd.xlane.f32.xlu0 %v1080_v47 }
 0x64c   : > { %v1077_v0 = vpop.xlane.xlu1 %1076 }
 0x64d   : > { %v1078_v50 = vmul.f32 0.03125, %v1077_v0 }
 0x64e   : > { %v1082_v51 = vpop.xlane.xlu0 %1081 }
 0x64f   : > { %v1084_v52 = vmul.f32 %v1078_v50, %v1078_v50  ;;  %v1083_v53 = vmul.f32 0.03125, %v1082_v51  ;;  %v1086_v56 = vsub.f32 %v2031_v42, %v1078_v50 }
 0x651   : > { %v1085_v54 = vsub.f32 %v1083_v53, %v1084_v52 }
 0x653   : > { %v1087_v55 = vadd.f32 1e-05, %v1085_v54 }
 0x655   : > { %1651 = vrsqrt.f32 %v1087_v55 }
 0x662   : > { %v1652_v57 = vpop.eup %1651 }
 0x663   : > { %v1089_v58 = vmul.f32 %v1652_v57, %v1086_v56 }
 0x665   : > { %v1096_v59 = vmul.f32 %v1944_v16, %v1089_v58  ;;  %v1623_v16 = vld [vmem:[%s2125_s8 + $0x8] sm:$0xff]  }
 0x666   : > { %1519 = vmatpush3.bf16.msra.mxu1 %v1623_v16 }
 0x667   : > { %v1103_v60 = vadd.f32 %v1949_v18, %v1096_v59  ;;  %1520 = vmatprep.subr.bf16.mxu1 %v1766_v5  ;;  %v1624_v18 = vld [vmem:[%s2125_s8] sm:$0xff]  }
 0x669   : > { %v1104_v61 = vpack.c.bf16 %v1103_v60, %v1103_v60 }
 0x66a   : > { %1521 = vmatpush3.bf16.msra.mxu1 %v1624_v18 }
 0x66b   : > { %1511 = vmatmul.mubr.msk.bf16.vlgmr.msra.gmra.mxu0 %vm392_vm0, %v1104_v61 }
 0x72b   : > { %v1165_v2 = vpop.f32.mrf.mxu0 }
 0x72c   : > { %v1166_v3 = vadd.f32 %v1393_v1, %v1165_v2 }
 0x72d   : > { %v1512_v4 = vpop.f32.mrf.mxu0 }
 0x72e   : > { %v1172_v6 = vmul.f32 0.70710677, %v1166_v3  ;;  %v1171_v5 = vmul.f32 0.5, %v1166_v3 }
 0x72f   : > { %v1168_v7 = vpop.f32.mrf.mxu0 }
 0x730   : > { %1653 = verf.f32 %v1172_v6 }
 0x731   : > { %v1513_v8 = vpop.f32.mrf.mxu0 }
 0x73d   : > { %v1654_v9 = vpop.eup %1653 }
 0x73e   : > { %v1174_v10 = vadd.f32 1.0, %v1654_v9 }
 0x740   : > { %v1175_v11 = vmul.f32 %v1174_v10, %v1171_v5 }
 0x742   : > { %v1176_v12 = vpack.c.bf16 %v1175_v11, %v1175_v11 }
 0x744   : > { %1523 = vmatmul.mubr.msk.bf16.vlgmr.msra.gmra.mxu1 %vm1216_vm9, %v1176_v12 }
 0x804   : > { %v1254_v14 = vpop.f32.mrf.mxu1 }
 0x805   : > { %v1255_v15 = vadd.f32 %v1397_v13, %v1254_v14 }
 0x806   : > { %v1524_v17 = vpop.f32.mrf.mxu1 }
 0x807   : > { %v1260_v19 = vadd.f32 %v1255_v15, %v2031_v42 }
 0x808   : > { %v1257_v20 = vpop.f32.mrf.mxu1 }
 0x809   : > { %1261 = vst.msk [vmem:[%s379_s20] sm:$0xff] %vm392_vm0, %v1260_v19 }
 0x80a   : > { %v1525_v21 = vpop.f32.mrf.mxu1 }
 0x80b   : > { %1694 = shalt.err (!%p1691_p3)
}
 0x80c   : > { %s1695_s12 = scalar_lea.hbm %s2070_s11, 128  ;;  %s1699_s20 = scalar_lea.hbm %s2127_s10, 256 }
 0x80d   : > { %p1696_p5 = scmp.ne.s32.totalorder %s2070_s11, %s1695_s12  ;;  %p1700_p9 = scmp.lt.s32.totalorder %s2070_s11, %s2127_s10 }
 0x80e   : > { %p1701_p12 = scmp.lt.s32.totalorder %s1699_s20, %s1695_s12 }
 0x80f   : > { %p1697_p6 = pnand %p1696_p5, %p1878_p4 }
 0x810   : > { %p1702_p10 = por %p1701_p12, %p1700_p9 }
 0x811   : > { %p1698_p7 = pneg %p1697_p6 }
 0x813   : > { %p1703_p11 = pnand %p1702_p10, %p1698_p7 }
 0x815   : > { %1706 = shalt.err (!%p1703_p11)
}
 0x816   : > { %1530 = dma.vmem_to_hbm [thread:$0]  (%p1878_p4), %s2072_s22, 128, %s2070_s11, %s1263_s16  }
 0x817 PF: > { %p1542_p13 = scmp.ge.s32.totalorder %s1761_s18, 2  ;;  %s1289_s27 = sand.u32 1, %s1741_s13  }
 0x818   : > { %s1290_s28 = scalar_lea.sflag [#allocation6], %s1289_s27 }
 0x819   : > { %p1537_p0 = pnand %p1542_p13, %p1885_p8 }
 0x81b   : > { %p1538_p1 = pneg %p1537_p0 }
 0x81d   : > { %1736 = dma.done.wait (%p1538_p1), %s1290_s28, 128  }
 0x81e   : > { %1738 = vsyncadd (%p1538_p1), %s1290_s28, 4294967168  ;;  %s24_s18 = sadd.s32 1, %s1761_s18   ;;  %s2136_s16 = sld [smem:[#allocation10_spill]] }
 0x81f   : > { %p21_p2 = scmp.ge.s32.totalorder %s24_s18, 4   ;;  %s2137_s17 = sld [smem:[#allocation11_spill]] }
 0x820   : > { %s2138_s13 = smov %s1745_s14  ;;  %s2139_s14 = smov %s1749_s15 }
 0x821   : > { %s2140_s15 = smov %s1891_s26  ;;  %23 = sbr.rel (!%p21_p2) target bundleno = 5 (0x5), region = 106 }
 0x826   :  { %1295 = vsyncpa [#allocation5], 1 }
 0x827   :  { %1297 = vsyncpa [#allocation5 + $0x1], 1 }
 0x828   :  { %1298 = vsyncpa [#allocation6], 1 }
 0x829   :  { %1300 = vsyncpa [#allocation6 + $0x1], 1 }

</bundles_post_ra>
